<compile_context>
chip_gen: v6e
topology: v6e:2x2x1
jax: 0.10.0
libtpu: 0.0.40
codegen_flags: <defaults>
</compile_context>

<pallas_src>
import functools

import jax
import jax.numpy as jnp
from jax.experimental import pallas as pl
from jax.experimental.pallas import tpu as pltpu


def spatial_attention_kernel(xf_ref, xq_ref, a3_ref, wq_ref, wkv_ref,
                             wproj_ref, bproj_ref, mask_ref, bias_ref,
                             sel_ref, selt_ref, o_ref, *, scale, compute_dtype):
    R, TM, Np = a3_ref.shape          # sectors, token tile, (padded) tokens
    C = xf_ref.shape[-1]
    H = sel_ref.shape[-1]             # heads

    x_full = xf_ref[0]                                     # (Np, C) compute_dtype
    a3 = a3_ref[...].reshape(R * TM, Np)                   # merge 8-aligned leading dims (free)

    # pre_kv[r*TM + m, c] = sum_n assignment[m, n, r] * x[b, n, c]
    pre_kv = jnp.dot(a3, x_full, preferred_element_type=jnp.float32)          # (R*TM, C) f32
    pre_kv_c = pre_kv.astype(compute_dtype)

    # Fused K/V projection: one MXU matmul with a 2C-wide output, then split.
    kv = jnp.dot(pre_kv_c, wkv_ref[...], preferred_element_type=jnp.float32)  # (R*TM, 2C) f32
    k = kv[:, :C]
    v = kv[:, C:]

    q = jnp.dot(xq_ref[0], wq_ref[...], preferred_element_type=jnp.float32)   # (TM, C) f32

    k3 = k.reshape(R, TM, C)          # free split: TM is a multiple of 8
    v3 = v.reshape(R, TM, C)

    # All heads at once: logits[r, m, h] = sum_{c in head h} q[m, c] * k[r, m, c]
    prod = q[None, :, :] * k3                                                  # (R, TM, C) f32
    logits = jnp.dot(prod.reshape(R * TM, C), sel_ref[...],                    # (C, H) 0/1 selector
                     preferred_element_type=jnp.float32).reshape(R, TM, H)
    # * scale + relative_bias[r, h] + additive mask[r, m] (-1e30 where masked)
    logits = (logits * scale
              + bias_ref[...][:, None, :]          # (R, 1, H)
              + mask_ref[...][:, :, None])         # (R, TM, 1)

    # Softmax over the sector axis R (finite -1e30 keeps fully-masked rows NaN-free).
    m_max = jnp.max(logits, axis=0, keepdims=True)                             # (1, TM, H)
    p = jnp.exp(logits - m_max)
    denom = jnp.sum(p, axis=0, keepdims=True)
    p = p * pl.reciprocal(denom, approx=True)                                  # (R, TM, H)

    # context[m, c] = sum_r p[r, m, head(c)] * v[r, m, c]
    p_full = jnp.dot(p.reshape(R * TM, H), selt_ref[...],                      # (H, C) selector^T
                     preferred_element_type=jnp.float32).reshape(R, TM, C)
    ctx = jnp.sum(p_full * v3, axis=0)                                         # (TM, C) f32

    y = jnp.dot(ctx.astype(compute_dtype), wproj_ref[...],
                preferred_element_type=jnp.float32) + bproj_ref[...]
    o_ref[0] = y.astype(o_ref.dtype)


def _round_up(a, b):
    return (a + b - 1) // b * b


def _choose_token_tile(n, r, c, cs, cap, requested):
    """Token tile TM: multiple of 8 (single tile) or multiple of 128 (tiled)."""
    if requested is None:
        if n <= 512:
            return _round_up(max(n, 8), 8)
        tm = 512
    else:
        tm = int(requested)
    if tm >= n:
        return _round_up(max(n, 8), 8)
    tm = max(128, _round_up(tm, 128))      # lane-dense mask tile requires 128-multiple
    while tm > 128:
        np_pad = _round_up(n, tm)
        need = 2 * r * tm * np_pad * cs + 12 * r * tm * c * 4
        if need <= 0.6 * cap:
            break
        tm //= 2
    return tm


def spatial_attention(x, assignment, mask, wq, wkv, rel_bias, wproj, bproj, *,
                      heads, token_tile=None, compute_dtype=jnp.bfloat16):
    B, N, C = x.shape
    R = assignment.shape[-1]
    assert C % heads == 0
    hd = C // heads
    scale = hd ** (-0.5)
    cs = jnp.dtype(compute_dtype).itemsize

    # Physical VMEM budget (v5e/v6e: 128 MiB, v7x: 64 MiB) with headroom.
    try:
        info = pltpu.get_tpu_info()
        phys = getattr(info, "vmem_capacity_bytes", None) or (64 * 1024 * 1024)
    except Exception:
        phys = 64 * 1024 * 1024
    cap = int(phys * 0.85)

    TM = _choose_token_tile(N, R, C, cs, cap, token_tile)
    Np = _round_up(N, TM)
    pad_n = Np - N

    # ---- wrapper-side glue (pure layout / tiny precomputes) ----------------
    if pad_n:
        # Padded n-rows contribute zero to pre_kv (assignment padded with 0);
        # padded query rows produce finite garbage and are sliced off below.
        x = jnp.pad(x, ((0, 0), (0, pad_n), (0, 0)))
        assignment = jnp.pad(assignment, ((0, pad_n), (0, pad_n), (0, 0)))
        mask = jnp.pad(mask, ((0, pad_n), (0, 0)), constant_values=False)

    # assignment laid out as (R, m, n): a3[r, m, n] = assignment[m, n, r]
    a3 = jnp.transpose(assignment, (2, 0, 1)).astype(compute_dtype)            # (R, Np, Np)
    wq_t = wq.T.astype(compute_dtype)                                          # (C, C)
    wkv_t = wkv.T.astype(compute_dtype)                                        # (C, 2C) -> [K | V]
    wproj_t = wproj.T.astype(compute_dtype)                                    # (C, C)
    bproj2 = bproj.reshape(1, C).astype(jnp.float32)

    # Lane-dense additive mask (R, Np) and tiny relative bias (R, H).
    mask_add = jnp.transpose(
        jnp.where(mask, jnp.float32(-1e30), jnp.float32(0.0)), (1, 0))         # (R, Np)
    rel_bias2 = jnp.transpose(rel_bias.reshape(heads, R), (1, 0)).astype(jnp.float32)  # (R, H)

    # 0/1 head-selector matrices (channel c belongs to head c // hd).
    c_idx = jnp.arange(C) // hd
    head_sel = (c_idx[:, None] == jnp.arange(heads)[None, :]).astype(jnp.float32)   # (C, H)
    head_sel_t = head_sel.T                                                          # (H, C)

    x_c = x.astype(compute_dtype)

    # ---- VMEM budget (double-buffered blocks + f32 intermediates) ----------
    blk_in = (Np * C * cs + TM * C * cs + R * TM * Np * cs
              + (2 * C * C + 2 * C * C) * cs + C * 4
              + R * TM * 4 + R * heads * 4 + 2 * C * heads * 4)
    blk_out = TM * C * jnp.dtype(x.dtype).itemsize
    interm = 12 * R * TM * C * 4 + 3 * R * TM * heads * 4 + 4 * TM * C * 4
    vmem_limit = int(min(cap, max(16 * 1024 * 1024,
                                  2 * (blk_in + blk_out) + interm + (2 << 20))))

    kernel = functools.partial(spatial_attention_kernel,
                               scale=scale, compute_dtype=compute_dtype)

    out = pl.pallas_call(
        kernel,
        out_shape=jax.ShapeDtypeStruct((B, Np, C), x.dtype),
        grid_spec=pltpu.PrefetchScalarGridSpec(
            num_scalar_prefetch=0,
            # batch innermost: a3 / mask blocks keep the same index across the
            # inner b loop -> no re-DMA of the dominant stream.
            grid=(Np // TM, B),
            in_specs=[
                pl.BlockSpec((1, Np, C), lambda m, b: (b, 0, 0)),        # x (all tokens, for pre_kv)
                pl.BlockSpec((1, TM, C), lambda m, b: (b, m, 0)),        # x query tile
                pl.BlockSpec((R, TM, Np), lambda m, b: (0, m, 0)),       # assignment (token-tiled)
                pl.BlockSpec((C, C), lambda m, b: (0, 0)),               # Wq^T
                pl.BlockSpec((C, 2 * C), lambda m, b: (0, 0)),           # Wkv^T (fused K|V)
                pl.BlockSpec((C, C), lambda m, b: (0, 0)),               # Wproj^T
                pl.BlockSpec((1, C), lambda m, b: (0, 0)),               # proj bias
                pl.BlockSpec((R, TM), lambda m, b: (0, m)),              # additive mask (lane-dense)
                pl.BlockSpec((R, heads), lambda m, b: (0, 0)),           # relative bias
                pl.BlockSpec((C, heads), lambda m, b: (0, 0)),           # head selector
                pl.BlockSpec((heads, C), lambda m, b: (0, 0)),           # head selector^T
            ],
            out_specs=pl.BlockSpec((1, TM, C), lambda m, b: (b, m, 0)),
        ),
        compiler_params=pltpu.CompilerParams(
            # token-tile axis is the (mega-core sharded) parallel one; batch is
            # the sequential inner loop that reuses the resident a3 tile.
            dimension_semantics=("parallel", "arbitrary"),
            vmem_limit_bytes=vmem_limit,
        ),
    )(x_c, x_c, a3, wq_t, wkv_t, wproj_t, bproj2, mask_add, rel_bias2,
      head_sel, head_sel_t)

    return out if pad_n == 0 else out[:, :N, :]


def reference(x, assignment, mask, wq, wkv, rel_bias, wproj, bproj, *, heads):
    """Pure-JAX transcription of the PyTorch forward (f32, highest precision)."""
    B, N, C = x.shape
    R = assignment.shape[-1]
    hd = C // heads
    scale = hd ** (-0.5)
    hp = jax.lax.Precision.HIGHEST
    mm = functools.partial(jnp.matmul, precision=hp)
    pre_kv = jnp.einsum('bnc,mnr->bmrc', x, assignment, precision=hp).reshape(B * N, R, C)
    pre_q = x.reshape(B * N, 1, C)
    q = mm(pre_q, wq.T).reshape(B * N, 1, heads, hd).transpose(0, 2, 1, 3)
    kv = mm(pre_kv, wkv.T).reshape(B * N, R, 2, heads, hd).transpose(2, 0, 3, 1, 4)
    k, v = kv[0], kv[1]
    attn = mm(q, jnp.swapaxes(k, -2, -1)) * scale
    attn = attn.reshape(B, N, heads, 1, R) + rel_bias
    m = mask.reshape(1, N, 1, 1, R)
    attn = jnp.where(m, -jnp.inf, attn).reshape(B * N, heads, 1, R)
    attn = jax.nn.softmax(attn, axis=-1)
    out = mm(attn, v).transpose(0, 2, 1, 3).reshape(B, N, C)
    return mm(out, wproj.T) + bproj


if __name__ == "__main__":
    B, N, C = 2, 8, 32
    heads = 4
    R = 17  # num_sectors (module default)

    key = jax.random.PRNGKey(0)
    kx, ka, km, kq, kkv, kb, kp, kpb = jax.random.split(key, 8)

    x = jax.random.normal(kx, (B, N, C), dtype=jnp.float32)
    assignment = jax.random.normal(ka, (N, N, R), dtype=jnp.float32)

    # Boolean mask over (N, R); True == masked. Keep >=1 unmasked sector per
    # row so the -inf reference softmax stays finite (the kernel itself is
    # NaN-safe even for fully masked rows via the -1e30 additive mask; such a
    # row yields uniform attention rather than NaN — documented divergence).
    mask = jax.random.uniform(km, (N, R)) < 0.3
    mask = mask.at[:, 0].set(False)

    # nn.Linear convention: weight is (out_features, in_features), qkv_bias=False.
    wq = jax.random.normal(kq, (C, C), dtype=jnp.float32) * 0.1
    wkv = jax.random.normal(kkv, (2 * C, C), dtype=jnp.float32) * 0.1
    rel_bias = jax.random.normal(kb, (heads, 1, R), dtype=jnp.float32)
    wproj = jax.random.normal(kp, (C, C), dtype=jnp.float32) * 0.1
    bproj = jax.random.normal(kpb, (C,), dtype=jnp.float32) * 0.1
    # proj_drop has p=0.0 -> identity.

    ref = reference(x, assignment, mask, wq, wkv, rel_bias, wproj, bproj, heads=heads)

    # f32 compute path (note: MXU default precision may still round operands).
    out_f32 = spatial_attention(x, assignment, mask, wq, wkv, rel_bias, wproj, bproj,
                                heads=heads, compute_dtype=jnp.float32)
    out_f32 = jax.block_until_ready(out_f32)
    assert out_f32.shape == (B, N, C)
    assert jnp.allclose(out_f32, ref, atol=5e-2, rtol=5e-2), "f32 kernel mismatch vs reference"

    # Optimized bf16-matmul path (f32 accumulation / softmax): looser tolerance.
    out_bf16 = spatial_attention(x, assignment, mask, wq, wkv, rel_bias, wproj, bproj,
                                 heads=heads, compute_dtype=jnp.bfloat16)
    out_bf16 = jax.block_until_ready(out_bf16)
    assert out_bf16.shape == (B, N, C)
    assert jnp.allclose(out_bf16, ref, atol=1.5e-1, rtol=1.5e-1), "bf16 kernel mismatch vs reference"

    print("KERNEL_OK")
</pallas_src>

<mosaic_0001>
module attributes {stable_mosaic.version = 11 : i64} {
  func.func @spatial_attention_kernel(%arg0: i32, %arg1: i32, %arg2: memref<1x8x32xf32, #tpu.memory_space<vmem>>, %arg3: memref<1x8x32xf32, #tpu.memory_space<vmem>>, %arg4: memref<17x8x8xf32, #tpu.memory_space<vmem>>, %arg5: memref<32x32xf32, #tpu.memory_space<vmem>>, %arg6: memref<32x64xf32, #tpu.memory_space<vmem>>, %arg7: memref<32x32xf32, #tpu.memory_space<vmem>>, %arg8: memref<1x32xf32, #tpu.memory_space<vmem>>, %arg9: memref<17x8xf32, #tpu.memory_space<vmem>>, %arg10: memref<17x4xf32, #tpu.memory_space<vmem>>, %arg11: memref<32x4xf32, #tpu.memory_space<vmem>>, %arg12: memref<4x32xf32, #tpu.memory_space<vmem>>, %arg13: memref<1x8x32xf32, #tpu.memory_space<vmem>>) attributes {dimension_semantics = [#tpu.dimension_semantics<parallel>, #tpu.dimension_semantics<arbitrary>], iteration_bounds = array<i64: 1, 2>, scalar_prefetch = 0 : i64, scratch_operands = 0 : i64, tpu.core_type = #tpu.core_type<tc>, window_params = [{transform_indices = @transform_0, window_bounds = array<i64: 1, 8, 32>}, {transform_indices = @transform_1, window_bounds = array<i64: 1, 8, 32>}, {transform_indices = @transform_2, window_bounds = array<i64: 17, 8, 8>}, {pipeline_mode = #tpu.pipeline_mode<synchronous>, transform_indices = @transform_3, window_bounds = array<i64: 32, 32>}, {pipeline_mode = #tpu.pipeline_mode<synchronous>, transform_indices = @transform_4, window_bounds = array<i64: 32, 64>}, {pipeline_mode = #tpu.pipeline_mode<synchronous>, transform_indices = @transform_5, window_bounds = array<i64: 32, 32>}, {pipeline_mode = #tpu.pipeline_mode<synchronous>, transform_indices = @transform_6, window_bounds = array<i64: 1, 32>}, {transform_indices = @transform_7, window_bounds = array<i64: 17, 8>}, {pipeline_mode = #tpu.pipeline_mode<synchronous>, transform_indices = @transform_8, window_bounds = array<i64: 17, 4>}, {pipeline_mode = #tpu.pipeline_mode<synchronous>, transform_indices = @transform_9, window_bounds = array<i64: 32, 4>}, {pipeline_mode = #tpu.pipeline_mode<synchronous>, transform_indices = @transform_10, window_bounds = array<i64: 4, 32>}, {transform_indices = @transform_11, window_bounds = array<i64: 1, 8, 32>}]} {
    %c0 = arith.constant 0 : index
    %c0_0 = arith.constant 0 : index
    %c0_1 = arith.constant 0 : index
    %0 = vector.load %arg2[%c0, %c0_0, %c0_1] : memref<1x8x32xf32, #tpu.memory_space<vmem>>, vector<1x8x32xf32>
    %1 = vector.shape_cast %0 : vector<1x8x32xf32> to vector<8x32xf32>
    %c0_2 = arith.constant 0 : index
    %c0_3 = arith.constant 0 : index
    %c0_4 = arith.constant 0 : index
    %2 = vector.load %arg4[%c0_2, %c0_3, %c0_4] : memref<17x8x8xf32, #tpu.memory_space<vmem>>, vector<17x8x8xf32>
    %3 = vector.shape_cast %2 : vector<17x8x8xf32> to vector<136x8xf32>
    %cst = arith.constant dense<0.000000e+00> : vector<136x32xf32>
    %4 = tpu.matmul %3, %1, %cst {dimension_numbers = #tpu.dot_dimension_numbers<[1], [0], [0], [1], [0, 0, 1, 1], [], []>} : vector<136x8xf32>, vector<8x32xf32>, vector<136x32xf32> -> vector<136x32xf32>
    %c0_5 = arith.constant 0 : index
    %c0_6 = arith.constant 0 : index
    %5 = vector.load %arg6[%c0_5, %c0_6] : memref<32x64xf32, #tpu.memory_space<vmem>>, vector<32x64xf32>
    %cst_7 = arith.constant dense<0.000000e+00> : vector<136x64xf32>
    %6 = tpu.matmul %4, %5, %cst_7 {dimension_numbers = #tpu.dot_dimension_numbers<[1], [0], [0], [1], [0, 0, 1, 1], [], []>} : vector<136x32xf32>, vector<32x64xf32>, vector<136x64xf32> -> vector<136x64xf32>
    %7 = vector.extract_strided_slice %6 {offsets = [0, 0], sizes = [136, 32], strides = [1, 1]} : vector<136x64xf32> to vector<136x32xf32>
    %8 = vector.extract_strided_slice %6 {offsets = [0, 32], sizes = [136, 32], strides = [1, 1]} : vector<136x64xf32> to vector<136x32xf32>
    %c0_8 = arith.constant 0 : index
    %c0_9 = arith.constant 0 : index
    %c0_10 = arith.constant 0 : index
    %9 = vector.load %arg3[%c0_8, %c0_9, %c0_10] : memref<1x8x32xf32, #tpu.memory_space<vmem>>, vector<1x8x32xf32>
    %10 = vector.shape_cast %9 : vector<1x8x32xf32> to vector<8x32xf32>
    %c0_11 = arith.constant 0 : index
    %c0_12 = arith.constant 0 : index
    %11 = vector.load %arg5[%c0_11, %c0_12] : memref<32x32xf32, #tpu.memory_space<vmem>>, vector<32x32xf32>
    %cst_13 = arith.constant dense<0.000000e+00> : vector<8x32xf32>
    %12 = tpu.matmul %10, %11, %cst_13 {dimension_numbers = #tpu.dot_dimension_numbers<[1], [0], [0], [1], [0, 0, 1, 1], [], []>} : vector<8x32xf32>, vector<32x32xf32>, vector<8x32xf32> -> vector<8x32xf32>
    %13 = vector.shape_cast %7 : vector<136x32xf32> to vector<17x8x32xf32>
    %14 = vector.shape_cast %8 : vector<136x32xf32> to vector<17x8x32xf32>
    %15 = vector.shape_cast %12 : vector<8x32xf32> to vector<1x8x32xf32>
    %16 = vector.broadcast %15 : vector<1x8x32xf32> to vector<17x8x32xf32>
    %17 = arith.mulf %16, %13 : vector<17x8x32xf32>
    %18 = vector.shape_cast %17 : vector<17x8x32xf32> to vector<136x32xf32>
    %c0_14 = arith.constant 0 : index
    %c0_15 = arith.constant 0 : index
    %19 = vector.load %arg11[%c0_14, %c0_15] : memref<32x4xf32, #tpu.memory_space<vmem>>, vector<32x4xf32>
    %cst_16 = arith.constant dense<0.000000e+00> : vector<136x4xf32>
    %20 = tpu.matmul %18, %19, %cst_16 {dimension_numbers = #tpu.dot_dimension_numbers<[1], [0], [0], [1], [0, 0, 1, 1], [], []>} : vector<136x32xf32>, vector<32x4xf32>, vector<136x4xf32> -> vector<136x4xf32>
    %21 = vector.shape_cast %20 : vector<136x4xf32> to vector<17x8x4xf32>
    %cst_17 = arith.constant 0.353553385 : f32
    %22 = vector.broadcast %cst_17 : f32 to vector<17x8x4xf32>
    %23 = arith.mulf %21, %22 : vector<17x8x4xf32>
    %c0_18 = arith.constant 0 : index
    %c0_19 = arith.constant 0 : index
    %24 = vector.load %arg10[%c0_18, %c0_19] : memref<17x4xf32, #tpu.memory_space<vmem>>, vector<17x4xf32>
    %25 = vector.shape_cast %24 : vector<17x4xf32> to vector<17x1x4xf32>
    %26 = vector.broadcast %25 : vector<17x1x4xf32> to vector<17x8x4xf32>
    %27 = arith.addf %23, %26 : vector<17x8x4xf32>
    %c0_20 = arith.constant 0 : index
    %c0_21 = arith.constant 0 : index
    %28 = vector.load %arg9[%c0_20, %c0_21] : memref<17x8xf32, #tpu.memory_space<vmem>>, vector<17x8xf32>
    %29 = vector.shape_cast %28 : vector<17x8xf32> to vector<17x8x1xf32>
    %30 = vector.broadcast %29 : vector<17x8x1xf32> to vector<17x8x4xf32>
    %31 = arith.addf %27, %30 : vector<17x8x4xf32>
    %cst_22 = arith.constant dense<0xFF800000> : vector<8x4xf32>
    %32 = vector.multi_reduction <maximumf>, %31, %cst_22 [0] : vector<17x8x4xf32> to vector<8x4xf32>
    %33 = vector.shape_cast %32 : vector<8x4xf32> to vector<1x8x4xf32>
    %34 = vector.broadcast %33 : vector<1x8x4xf32> to vector<17x8x4xf32>
    %35 = arith.subf %31, %34 : vector<17x8x4xf32>
    %36 = math.exp %35 : vector<17x8x4xf32>
    %cst_23 = arith.constant dense<0.000000e+00> : vector<8x4xf32>
    %37 = vector.multi_reduction <add>, %36, %cst_23 [0] : vector<17x8x4xf32> to vector<8x4xf32>
    %38 = vector.shape_cast %37 : vector<8x4xf32> to vector<1x8x4xf32>
    %39 = tpu.reciprocal %38 {approx = true} : vector<1x8x4xf32> -> vector<1x8x4xf32>
    %40 = vector.broadcast %39 : vector<1x8x4xf32> to vector<17x8x4xf32>
    %41 = arith.mulf %36, %40 : vector<17x8x4xf32>
    %42 = vector.shape_cast %41 : vector<17x8x4xf32> to vector<136x4xf32>
    %c0_24 = arith.constant 0 : index
    %c0_25 = arith.constant 0 : index
    %43 = vector.load %arg12[%c0_24, %c0_25] : memref<4x32xf32, #tpu.memory_space<vmem>>, vector<4x32xf32>
    %cst_26 = arith.constant dense<0.000000e+00> : vector<136x32xf32>
    %44 = tpu.matmul %42, %43, %cst_26 {dimension_numbers = #tpu.dot_dimension_numbers<[1], [0], [0], [1], [0, 0, 1, 1], [], []>} : vector<136x4xf32>, vector<4x32xf32>, vector<136x32xf32> -> vector<136x32xf32>
    %45 = vector.shape_cast %44 : vector<136x32xf32> to vector<17x8x32xf32>
    %46 = arith.mulf %45, %14 : vector<17x8x32xf32>
    %cst_27 = arith.constant dense<0.000000e+00> : vector<8x32xf32>
    %47 = vector.multi_reduction <add>, %46, %cst_27 [0] : vector<17x8x32xf32> to vector<8x32xf32>
    %c0_28 = arith.constant 0 : index
    %c0_29 = arith.constant 0 : index
    %48 = vector.load %arg7[%c0_28, %c0_29] : memref<32x32xf32, #tpu.memory_space<vmem>>, vector<32x32xf32>
    %cst_30 = arith.constant dense<0.000000e+00> : vector<8x32xf32>
    %49 = tpu.matmul %47, %48, %cst_30 {dimension_numbers = #tpu.dot_dimension_numbers<[1], [0], [0], [1], [0, 0, 1, 1], [], []>} : vector<8x32xf32>, vector<32x32xf32>, vector<8x32xf32> -> vector<8x32xf32>
    %c0_31 = arith.constant 0 : index
    %c0_32 = arith.constant 0 : index
    %50 = vector.load %arg8[%c0_31, %c0_32] : memref<1x32xf32, #tpu.memory_space<vmem>>, vector<1x32xf32>
    %51 = vector.broadcast %50 : vector<1x32xf32> to vector<8x32xf32>
    %52 = arith.addf %49, %51 : vector<8x32xf32>
    %c0_33 = arith.constant 0 : index
    %c0_34 = arith.constant 0 : index
    %c0_35 = arith.constant 0 : index
    %53 = vector.load %arg13[%c0_33, %c0_34, %c0_35] : memref<1x8x32xf32, #tpu.memory_space<vmem>>, vector<1x8x32xf32>
    %54 = vector.shape_cast %53 : vector<1x8x32xf32> to vector<8x32xf32>
    %55 = vector.shape_cast %52 : vector<8x32xf32> to vector<1x8x32xf32>
    tpu.vector_store %arg13[%c0_33, %c0_34, %c0_35], %55 {strides = array<i32>} : memref<1x8x32xf32, #tpu.memory_space<vmem>>, vector<1x8x32xf32>,
    return
  }
  func.func @transform_0(%arg0: i32, %arg1: i32) -> (i32, i32, i32) {
    %c0_i32 = arith.constant 0 : i32
    %c0_i32_0 = arith.constant 0 : i32
    %c0_i32_1 = arith.constant 0 : i32
    return %arg1, %c0_i32, %c0_i32_0 : i32, i32, i32
  }
  func.func @transform_1(%arg0: i32, %arg1: i32) -> (i32, i32, i32) {
    %c0_i32 = arith.constant 0 : i32
    %c0_i32_0 = arith.constant 0 : i32
    return %arg1, %arg0, %c0_i32 : i32, i32, i32
  }
  func.func @transform_2(%arg0: i32, %arg1: i32) -> (i32, i32, i32) {
    %c0_i32 = arith.constant 0 : i32
    %c0_i32_0 = arith.constant 0 : i32
    %c0_i32_1 = arith.constant 0 : i32
    return %c0_i32, %arg0, %c0_i32_0 : i32, i32, i32
  }
  func.func @transform_3(%arg0: i32, %arg1: i32) -> (i32, i32) {
    %c0_i32 = arith.constant 0 : i32
    %c0_i32_0 = arith.constant 0 : i32
    %c0_i32_1 = arith.constant 0 : i32
    return %c0_i32, %c0_i32_0 : i32, i32
  }
  func.func @transform_4(%arg0: i32, %arg1: i32) -> (i32, i32) {
    %c0_i32 = arith.constant 0 : i32
    %c0_i32_0 = arith.constant 0 : i32
    %c0_i32_1 = arith.constant 0 : i32
    return %c0_i32, %c0_i32_0 : i32, i32
  }
  func.func @transform_5(%arg0: i32, %arg1: i32) -> (i32, i32) {
    %c0_i32 = arith.constant 0 : i32
    %c0_i32_0 = arith.constant 0 : i32
    %c0_i32_1 = arith.constant 0 : i32
    return %c0_i32, %c0_i32_0 : i32, i32
  }
  func.func @transform_6(%arg0: i32, %arg1: i32) -> (i32, i32) {
    %c0_i32 = arith.constant 0 : i32
    %c0_i32_0 = arith.constant 0 : i32
    %c0_i32_1 = arith.constant 0 : i32
    return %c0_i32, %c0_i32_0 : i32, i32
  }
  func.func @transform_7(%arg0: i32, %arg1: i32) -> (i32, i32) {
    %c0_i32 = arith.constant 0 : i32
    %c0_i32_0 = arith.constant 0 : i32
    return %c0_i32, %arg0 : i32, i32
  }
  func.func @transform_8(%arg0: i32, %arg1: i32) -> (i32, i32) {
    %c0_i32 = arith.constant 0 : i32
    %c0_i32_0 = arith.constant 0 : i32
    %c0_i32_1 = arith.constant 0 : i32
    return %c0_i32, %c0_i32_0 : i32, i32
  }
  func.func @transform_9(%arg0: i32, %arg1: i32) -> (i32, i32) {
    %c0_i32 = arith.constant 0 : i32
    %c0_i32_0 = arith.constant 0 : i32
    %c0_i32_1 = arith.constant 0 : i32
    return %c0_i32, %c0_i32_0 : i32, i32
  }
  func.func @transform_10(%arg0: i32, %arg1: i32) -> (i32, i32) {
    %c0_i32 = arith.constant 0 : i32
    %c0_i32_0 = arith.constant 0 : i32
    %c0_i32_1 = arith.constant 0 : i32
    return %c0_i32, %c0_i32_0 : i32, i32
  }
  func.func @transform_11(%arg0: i32, %arg1: i32) -> (i32, i32, i32) {
    %c0_i32 = arith.constant 0 : i32
    %c0_i32_0 = arith.constant 0 : i32
    return %arg1, %arg0, %c0_i32 : i32, i32, i32
  }
}

</mosaic_0001>

<bundles_post_ra>
// kernel: tpu_custom_call.1
= control target key start
LH: loop header
LB: loop body
LE: loop exit
PB: predicated region body
PF: predicated region fallthrough
CT: control target
= control target key end

     0   :  { %s3676_s0 = inlined_call_operand.vmem [shape: f32[2,8,32], index: 0, kind: input, shape index: {}]   ;;  %s3677_s1 = inlined_call_operand.vmem [shape: f32[2,8,32], index: 1, kind: input, shape index: {}]   ;;  %s3678_s2 = inlined_call_operand.vmem [shape: f32[17,8,8], index: 2, kind: input, shape index: {}]   ;;  %s3679_s3 = inlined_call_operand.vmem [shape: f32[32,32], index: 3, kind: input, shape index: {}]   ;;  %s3680_s4 = inlined_call_operand.vmem [shape: f32[32,64], index: 4, kind: input, shape index: {}]   ;;  %s3681_s5 = inlined_call_operand.vmem [shape: f32[32,32], index: 5, kind: input, shape index: {}]   ;;  %s3682_s6 = inlined_call_operand.vmem [shape: f32[1,32], index: 6, kind: input, shape index: {}]   ;;  %s3683_s7 = inlined_call_operand.vmem [shape: f32[17,8], index: 7, kind: input, shape index: {}]   ;;  %s3684_s8 = inlined_call_operand.vmem [shape: f32[17,4], index: 8, kind: input, shape index: {}]   ;;  %s3685_s9 = inlined_call_operand.vmem [shape: f32[32,4], index: 9, kind: input, shape index: {}]   ;;  %s3686_s10 = inlined_call_operand.vmem [shape: f32[4,32], index: 10, kind: input, shape index: {}]   ;;  %s3687_s11 = inlined_call_operand.hbm [shape: f32[2,8,32], index: 11, kind: output, shape index: {}]  }
   0x1   :  { %3690 = sst [smem:[#allocation7_spill]] %s3676_s0 }
   0x2   :  { %16 = vsyncpa [#allocation3], 0 }
   0x3   :  { %18 = vsyncpa [#allocation3 + $0x1], 0  ;;  %s2895_s17 = smov 0   ;;  %s2897_s18 = smov 0  }
   0x4   :  { %s2899_s19 = smov 0   ;;  %s2901_s20 = smov 0  }
   0x5   :  { %s2903_s21 = smov 0   ;;  %s2905_s22 = smov 0  }
   0x6 LB: > { %3691 = sst [smem:[#allocation5_spill]] %s2824_s21  ;;  %s2233_s23 = sadd.s32 4294967295, %s2828_s22   ;;  %s2828_s22 = sphi %s2905_s22, %s24_s22   ;;  %s2824_s21 = sphi %s2903_s21, %s3697_s21   ;;  %s2820_s20 = sphi %s2901_s20, %s3696_s20   ;;  %s2816_s19 = sphi %s2899_s19, %s3700_s19   ;;  %s2812_s18 = sphi %s2897_s18, %s3699_s18   ;;  %s2808_s17 = sphi %s2895_s17, %s3698_s17  }
   0x7   : > { %s2234_s24 = sadd.s32 4294967294, %s2828_s22   ;;  %s33_s25 = sadd.s32 1, %s2824_s21 }
   0x8   : > { %s298_s26 = sadd.s32 1, %s2816_s19  ;;  %p34_p0 = scmp.ge.s32.totalorder %s33_s25, 2 }
   0x9   : > { %p308_p1 = scmp.ne.s32.totalorder %s2816_s19, %s2812_s18  ;;  %p309_p2 = scmp.eq.s32.totalorder %s2233_s23, 1 }
   0xa   : > { %p314_p3 = scmp.ne.s32.totalorder %s2812_s18, %s2808_s17  ;;  %s3702_s25 = smov (%p34_p0, %s33_s25), 0 }
   0xb   : > { %3692 = sst [smem:[#allocation6_spill]] %s3702_s25  ;;  %p2935_p4 = por %p309_p2, %p308_p1 }
   0xc   : > { %p315_p5 = scmp.eq.s32.totalorder %s2234_s24, 1  ;;  %s293_s28 = ssub.s32 %s2824_s21, %s3702_s25 }
   0xd   : > { %p2239_p6 = scmp.ge.s32.totalorder %s2828_s22, 1  ;;  %p296_p7 = scmp.eq.s32.totalorder %s293_s28, 0 }
   0xe   : > { %p2942_p8 = por %p315_p5, %p314_p3  ;;  %p385_p9 = scmp.lt.s32.totalorder %s2828_s22, 3 }
   0xf   : > { %s2948_s30 = scalar_select %p296_p7, %s2816_s19, %s298_s26  }
  0x10   : > { %p386_p10 = pnand %p2239_p6, %p385_p9 }
  0x11   : > { %p439_p11 = scmp.lt.s32.totalorder (!%p386_p10), %s2820_s20, 1  ;;  %s3695_s0 = sld [smem:[#allocation7_spill]] (!%p386_p10) }
  0x12   : > { %389 = sbr.rel (%p386_p10) target bundleno = 1225 (0x4c9), region = 64  ;;  %s2832_s23 = smov (!%p386_p10), 96  }
  0x13   : > { %s436_s14 = sand.u32 (!%p386_p10), 1, %s2812_s18  }
  0x14   : > { %s2240_s15 = sshll.u32 (!%p386_p10), %s436_s14, 3 }
  0x17   : > { %v2830_v0 = vmov 0.0   ;;  %vm2831_vm0 = vmmov 0   ;;  %s2955_s12 = scalar_select %p439_p11, %s2820_s20, 1  ;;  %v459_v1 = vld [vmem:[%s3678_s2] sm:$0xff]  ;;  %vm476_vm1 = vcmask 64512   ;;  %v888_v3 = vld [vmem:[%s3679_s3 + $0x18] sm:$0xff]  ;;  %v1211_v28 = vlaneseq }
  0x18   : > { %2409 = vmatprep.subr.mxu0 %v2830_v0  ;;  %2411 = vmatprep.mubr.msk.f32.mxu0 %vm2831_vm0, %v2830_v0  ;;  %v887_v4 = vld [vmem:[%s3679_s3 + $0x10] sm:$0xff]  ;;  %v681_v5 = vld [vmem:[%s3680_s4 + $0x18] sm:$0xff]  ;;  %v460_v6 = vld [vmem:[%s3678_s2 + $0x8] sm:$0xff]  ;;  %vm682_vm2 = vcmask 261120   ;;  %vm1748_vm3 = vcmask 1043456   ;;  %vm1560_vm4 = vcmask 31744  }
  0x19   : > { %2462 = vmatprep.subr.mxu1 %v2830_v0  ;;  %2470 = vmatprep.mubr.msk.f32.mxu1 %vm2831_vm0, %v2830_v0  ;;  %s2241_s13 = sshll.u32 %s2955_s12, 3  ;;  %v886_v7 = vld [vmem:[%s3679_s3 + $0x8] sm:$0xff]  ;;  %v680_v8 = vld [vmem:[%s3680_s4 + $0x10] sm:$0xff]  ;;  %v885_v9 = vld [vmem:[%s3679_s3] sm:$0xff]  ;;  %v3109_v29 = vshrl.u32 %v1211_v28, 7 }
  0x1a   : > { %s442_s16 = scalar_lea.vmem %s3695_s0, %s2241_s13  ;;  %2463 = vmatpush3.msra.mxu1 %v681_v5  ;;  %v461_v10 = vld [vmem:[%s3678_s2 + $0x10] sm:$0xff]  ;;  %v679_v11 = vld [vmem:[%s3680_s4 + $0x8] sm:$0xff]  ;;  %v462_v12 = vld [vmem:[%s3678_s2 + $0x18] sm:$0xff]  ;;  %s449_s28 = scalar_lea.vmem %s3677_s1, %s2241_s13 }
  0x1b   : > { %v458_v2 = vld [vmem:[%s442_s16] sm:$0xff]  ;;  %2464 = vmatprep.subr.mxu1 %v2830_v0  ;;  %v464_v14 = vld [vmem:[%s3678_s2 + $0x28] sm:$0xff]  ;;  %v465_v15 = vld [vmem:[%s3678_s2 + $0x30] sm:$0xff]  ;;  %v1433_v31 = vsub.s32 1, %v3109_v29  ;;  %v3116_v32 = vsub.s32 0, %v3109_v29  ;;  %v1440_v33 = vsub.s32 2, %v3109_v29 }
  0x1c   : > { %2410 = vmatpush3.msra.mxu0 %v458_v2  ;;  %2465 = vmatpush3.msra.mxu1 %v680_v8  ;;  %v463_v13 = vld [vmem:[%s3678_s2 + $0x20] sm:$0xff]  ;;  %v466_v16 = vld [vmem:[%s3678_s2 + $0x38] sm:$0xff]  ;;  %v468_v18 = vld [vmem:[%s3678_s2 + $0x48] sm:$0xff]  ;;  %v1454_v34 = vsub.s32 4, %v3109_v29  ;;  %v1461_v39 = vsub.s32 5, %v3109_v29  ;;  %v1447_v40 = vsub.s32 3, %v3109_v29 }
  0x1d   : > { %2412 = vmatmul.mubr.msk.f32.vlgmr.msra.gmra.mxu0 %vm476_vm1, %v459_v1  ;;  %2521 = vmatprep.subr.mxu0 %v2830_v0  ;;  %v467_v17 = vld [vmem:[%s3678_s2 + $0x40] sm:$0xff]  ;;  %v469_v19 = vld [vmem:[%s3678_s2 + $0x50] sm:$0xff]  ;;  %v470_v20 = vld [vmem:[%s3678_s2 + $0x58] sm:$0xff]  ;;  %v1475_v43 = vsub.s32 7, %v3109_v29  ;;  %v1468_v44 = vsub.s32 6, %v3109_v29  ;;  %s2318_s16 = sshll.u32 %s2820_s20, 7 }
  0x1e   : > { %2414 = vmatprep.mubr.msk.f32.mxu0 %vm2831_vm0, %v2830_v0  ;;  %2522 = vmatpush3.msra.mxu0 %v888_v3  ;;  %v471_v21 = vld [vmem:[%s3678_s2 + $0x60] sm:$0xff]  ;;  %v472_v22 = vld [vmem:[%s3678_s2 + $0x68] sm:$0xff]  ;;  %v473_v23 = vld [vmem:[%s3678_s2 + $0x70] sm:$0xff]  ;;  %s3635_s25 = scalar_lea.hbm %s3687_s11, %s2318_s16  ;;  %s2834_s20 = smov [#allocation2]  }
  0x1f   : > { %2523 = vmatprep.subr.mxu0 %v2830_v0  ;;  %2466 = vmatprep.subr.mxu1 %v2830_v0  ;;  %v474_v24 = vld [vmem:[%s3678_s2 + $0x78] sm:$0xff]  ;;  %v475_v25 = vld [vmem:[%s3678_s2 + $0x80] sm:$0xff]  ;;  %v1422_v47 = vld [vmem:[%s3683_s7 + $0x8] sm:$0xff] }
  0x20   : > { %2524 = vmatpush3.msra.mxu0 %v887_v4  ;;  %2467 = vmatpush3.msra.mxu1 %v679_v11  ;;  %v678_v26 = vld [vmem:[%s3680_s4] sm:$0xff]  ;;  %v1490_v48 = vrot.slane %v1422_v47, %v1433_v31  ;;  %v1483_v49 = vrot.slane %v1422_v47, %v3116_v32  ;;  %v1504_v50 = vrot.slane %v1422_v47, %v1447_v40  ;;  %v982_v56 = vld [vmem:[%s3685_s9 + $0x18] sm:$0xff]  ;;  %v981_v58 = vld [vmem:[%s3685_s9 + $0x10] sm:$0xff] }
  0x21   : > { %2415 = vmatmul.mubr.msk.f32.gmra.mxu0 %vm476_vm1, %v460_v6  ;;  %2525 = vmatprep.subr.mxu0 %v2830_v0  ;;  %v884_v27 = vld [vmem:[%s449_s28] sm:$0xff]  ;;  %v1497_v51 = vrot.slane %v1422_v47, %v1440_v33  ;;  %v1518_v52 = vrot.slane %v1422_v47, %v1461_v39  ;;  %v1511_v53 = vrot.slane %v1422_v47, %v1454_v34  ;;  %v980_v60 = vld [vmem:[%s3685_s9 + $0x8] sm:$0xff]  ;;  %s2106_s28 = scalar_lea.sflag [#allocation3], %s436_s14 }
  0x22   : > { %2417 = vmatprep.mubr.msk.f32.mxu0 %vm2831_vm0, %v2830_v0  ;;  %2526 = vmatpush3.msra.mxu0 %v886_v7  ;;  %v1421_v30 = vld [vmem:[%s3683_s7] sm:$0xff]  ;;  %v1532_v54 = vrot.slane %v1422_v47, %v1475_v43  ;;  %v1525_v55 = vrot.slane %v1422_v47, %v1468_v44 }
  0x23   : > { %2527 = vmatprep.subr.mxu0 %v2830_v0  ;;  %2468 = vmatprep.subr.mxu1 %v2830_v0  ;;  %v1434_v35 = vrot.slane %v1421_v30, %v1433_v31  ;;  %v1427_v36 = vrot.slane %v1421_v30, %v3116_v32  ;;  %v1441_v37 = vrot.slane %v1421_v30, %v1440_v33  ;;  %v979_v62 = vld [vmem:[%s3685_s9] sm:$0xff]  ;;  %v2296_v31 = vld [vmem:[%s3683_s7 + $0x10] ss:$0 sm:$0xff] }
  0x24   : > { %2528 = vmatpush3.msra.mxu0 %v885_v9  ;;  %2469 = vmatpush3.msra.mxu1 %v678_v26  ;;  %v1455_v38 = vrot.slane %v1421_v30, %v1454_v34  ;;  %v1462_v41 = vrot.slane %v1421_v30, %v1461_v39  ;;  %v1448_v42 = vrot.slane %v1421_v30, %v1447_v40 }
  0x25   : > { %2418 = vmatmul.mubr.msk.f32.gmra.mxu0 %vm476_vm1, %v461_v10  ;;  %2591 = vmatprep.subr.mxu0 %v2830_v0  ;;  %v1476_v45 = vrot.slane %v1421_v30, %v1475_v43  ;;  %v1469_v46 = vrot.slane %v1421_v30, %v1468_v44 }
  0x26   : > { %2420 = vmatprep.mubr.msk.f32.mxu0 %vm2831_vm0, %v2830_v0  ;;  %2532 = vmatprep.subr.mxu1 %v2830_v0 }
  0x27   : > { %1436 = vbcast.lane.b32.xlu1 %v1434_v35, 256  ;;  %1429 = vbcast.lane.b32.xlu0 %v1427_v36, 256 }
  0x29   : > { %2421 = vmatmul.mubr.msk.f32.gmra.mxu0 %vm476_vm1, %v462_v12 }
  0x2a   : > { %2423 = vmatprep.mubr.msk.f32.mxu0 %vm2831_vm0, %v2830_v0 }
  0x2b   : > { %1443 = vbcast.lane.b32.xlu1 %v1441_v37, 256  ;;  %1457 = vbcast.lane.b32.xlu0 %v1455_v38, 256 }
  0x2d   : > { %2424 = vmatmul.mubr.msk.f32.gmra.mxu0 %vm476_vm1, %v463_v13 }
  0x2e   : > { %2426 = vmatprep.mubr.msk.f32.mxu0 %vm2831_vm0, %v2830_v0 }
  0x2f   : > { %1464 = vbcast.lane.b32.xlu1 %v1462_v41, 256  ;;  %1450 = vbcast.lane.b32.xlu0 %v1448_v42, 256 }
  0x31   : > { %2427 = vmatmul.mubr.msk.f32.gmra.mxu0 %vm476_vm1, %v464_v14 }
  0x32   : > { %2429 = vmatprep.mubr.msk.f32.mxu0 %vm2831_vm0, %v2830_v0 }
  0x33   : > { %1478 = vbcast.lane.b32.xlu1 %v1476_v45, 256  ;;  %1471 = vbcast.lane.b32.xlu0 %v1469_v46, 256 }
  0x35   : > { %2430 = vmatmul.mubr.msk.f32.gmra.mxu0 %vm476_vm1, %v465_v15 }
  0x36   : > { %2432 = vmatprep.mubr.msk.f32.mxu0 %vm2831_vm0, %v2830_v0 }
  0x37   : > { %1492 = vbcast.lane.b32.xlu1 %v1490_v48, 256  ;;  %1485 = vbcast.lane.b32.xlu0 %v1483_v49, 256 }
  0x39   : > { %2433 = vmatmul.mubr.msk.f32.gmra.mxu0 %vm476_vm1, %v466_v16 }
  0x3a   : > { %2435 = vmatprep.mubr.msk.f32.mxu0 %vm2831_vm0, %v2830_v0 }
  0x3b   : > { %1506 = vbcast.lane.b32.xlu1 %v1504_v50, 256  ;;  %1499 = vbcast.lane.b32.xlu0 %v1497_v51, 256 }
  0x3d   : > { %2436 = vmatmul.mubr.msk.f32.gmra.mxu0 %vm476_vm1, %v467_v17 }
  0x3e   : > { %2438 = vmatprep.mubr.msk.f32.mxu0 %vm2831_vm0, %v2830_v0 }
  0x3f   : > { %1520 = vbcast.lane.b32.xlu1 %v1518_v52, 256  ;;  %1513 = vbcast.lane.b32.xlu0 %v1511_v53, 256 }
  0x41   : > { %2439 = vmatmul.mubr.msk.f32.gmra.mxu0 %vm476_vm1, %v468_v18 }
  0x42   : > { %2441 = vmatprep.mubr.msk.f32.mxu0 %vm2831_vm0, %v2830_v0 }
  0x43   : > { %1534 = vbcast.lane.b32.xlu1 %v1532_v54, 256  ;;  %1527 = vbcast.lane.b32.xlu0 %v1525_v55, 256 }
  0x45   : > { %2442 = vmatmul.mubr.msk.f32.gmra.mxu0 %vm476_vm1, %v469_v19 }
  0x46   : > { %2444 = vmatprep.mubr.msk.f32.mxu0 %vm2831_vm0, %v2830_v0 }
  0x47   : > { %1541 = vbcast.lane.b32.xlu0 %v2296_v31, 256 }
  0x49   : > { %2445 = vmatmul.mubr.msk.f32.gmra.mxu0 %vm476_vm1, %v470_v20 }
  0x4a   : > { %2447 = vmatprep.mubr.msk.f32.mxu0 %vm2831_vm0, %v2830_v0 }
  0x4d   : > { %2448 = vmatmul.mubr.msk.f32.gmra.mxu0 %vm476_vm1, %v471_v21 }
  0x4e   : > { %2450 = vmatprep.mubr.msk.f32.mxu0 %vm2831_vm0, %v2830_v0 }
  0x51   : > { %2451 = vmatmul.mubr.msk.f32.gmra.mxu0 %vm476_vm1, %v472_v22 }
  0x52   : > { %2453 = vmatprep.mubr.msk.f32.mxu0 %vm2831_vm0, %v2830_v0 }
  0x55   : > { %2454 = vmatmul.mubr.msk.f32.gmra.mxu0 %vm476_vm1, %v473_v23 }
  0x56   : > { %2456 = vmatprep.mubr.msk.f32.mxu0 %vm2831_vm0, %v2830_v0 }
  0x59   : > { %2457 = vmatmul.mubr.msk.f32.gmra.mxu0 %vm476_vm1, %v474_v24 }
  0x5a   : > { %2459 = vmatprep.mubr.msk.f32.mxu0 %vm2831_vm0, %v2830_v0 }
  0x5d   : > { %2460 = vmatmul.mubr.msk.f32.gmra.mxu0 %vm476_vm1, %v475_v25 }
  0x5e   : > { %2529 = vmatprep.mubr.msk.f32.mxu0 %vm2831_vm0, %v2830_v0 }
  0x61   : > { %2530 = vmatmul.mubr.msk.f32.vlgmr.msra.gmra.mxu0 %vm682_vm2, %v884_v27 }
  0x62   : > { %2593 = vmatprep.mubr.msk.f32.mxu0 %vm2831_vm0, %v2830_v0 }
  0xdd   : > { %v594_v57 = vpop.f32.mrf.mxu0 }
  0xde   : > { %2471 = vmatmul.mubr.msk.f32.vlgmr.msra.gmra.mxu1 %vm682_vm2, %v594_v57 }
  0xdf   : > { %v2413_v59 = vpop.f32.mrf.mxu0  ;;  %2473 = vmatprep.mubr.msk.f32.mxu1 %vm2831_vm0, %v2830_v0  ;;  %2533 = vmatpush3.msra.mxu1 %v982_v56 }
  0xe0   : > { %2534 = vmatprep.subr.mxu1 %v2830_v0 }
  0xe1   : > { %v599_v61 = vpop.f32.mrf.mxu0  ;;  %2535 = vmatpush3.msra.mxu1 %v981_v58 }
  0xe2   : > { %2474 = vmatmul.mubr.msk.f32.gmra.mxu1 %vm682_vm2, %v599_v61  ;;  %2536 = vmatprep.subr.mxu1 %v2830_v0 }
  0xe3   : > { %v2416_v63 = vpop.f32.mrf.mxu0  ;;  %2476 = vmatprep.mubr.msk.f32.mxu1 %vm2831_vm0, %v2830_v0  ;;  %2537 = vmatpush3.msra.mxu1 %v980_v60 }
  0xe4   : > { %2538 = vmatprep.subr.mxu1 %v2830_v0 }
  0xe5   : > { %v604_v1 = vpop.f32.mrf.mxu0  ;;  %2539 = vmatpush3.msra.mxu1 %v979_v62 }
  0xe6   : > { %2477 = vmatmul.mubr.msk.f32.gmra.mxu1 %vm682_vm2, %v604_v1 }
  0xe7   : > { %v2419_v2 = vpop.f32.mrf.mxu0  ;;  %2479 = vmatprep.mubr.msk.f32.mxu1 %vm2831_vm0, %v2830_v0 }
  0xe9   : > { %v609_v3 = vpop.f32.mrf.mxu0 }
  0xea   : > { %2480 = vmatmul.mubr.msk.f32.gmra.mxu1 %vm682_vm2, %v609_v3 }
  0xeb   : > { %v2422_v4 = vpop.f32.mrf.mxu0  ;;  %2482 = vmatprep.mubr.msk.f32.mxu1 %vm2831_vm0, %v2830_v0 }
  0xed   : > { %v614_v5 = vpop.f32.mrf.mxu0 }
  0xee   : > { %2483 = vmatmul.mubr.msk.f32.gmra.mxu1 %vm682_vm2, %v614_v5 }
  0xef   : > { %v2425_v6 = vpop.f32.mrf.mxu0  ;;  %2485 = vmatprep.mubr.msk.f32.mxu1 %vm2831_vm0, %v2830_v0 }
  0xf1   : > { %v619_v7 = vpop.f32.mrf.mxu0 }
  0xf2   : > { %2486 = vmatmul.mubr.msk.f32.gmra.mxu1 %vm682_vm2, %v619_v7 }
  0xf3   : > { %v2428_v8 = vpop.f32.mrf.mxu0  ;;  %2488 = vmatprep.mubr.msk.f32.mxu1 %vm2831_vm0, %v2830_v0 }
  0xf5   : > { %v624_v9 = vpop.f32.mrf.mxu0 }
  0xf6   : > { %2489 = vmatmul.mubr.msk.f32.gmra.mxu1 %vm682_vm2, %v624_v9 }
  0xf7   : > { %v2431_v10 = vpop.f32.mrf.mxu0  ;;  %2491 = vmatprep.mubr.msk.f32.mxu1 %vm2831_vm0, %v2830_v0 }
  0xf9   : > { %v629_v11 = vpop.f32.mrf.mxu0 }
  0xfa   : > { %2492 = vmatmul.mubr.msk.f32.gmra.mxu1 %vm682_vm2, %v629_v11 }
  0xfb   : > { %v2434_v12 = vpop.f32.mrf.mxu0  ;;  %2494 = vmatprep.mubr.msk.f32.mxu1 %vm2831_vm0, %v2830_v0 }
  0xfd   : > { %v634_v13 = vpop.f32.mrf.mxu0 }
  0xfe   : > { %2495 = vmatmul.mubr.msk.f32.gmra.mxu1 %vm682_vm2, %v634_v13 }
  0xff   : > { %v2437_v14 = vpop.f32.mrf.mxu0  ;;  %2497 = vmatprep.mubr.msk.f32.mxu1 %vm2831_vm0, %v2830_v0 }
 0x101   : > { %v639_v15 = vpop.f32.mrf.mxu0 }
 0x102   : > { %2498 = vmatmul.mubr.msk.f32.gmra.mxu1 %vm682_vm2, %v639_v15 }
 0x103   : > { %v2440_v16 = vpop.f32.mrf.mxu0  ;;  %2500 = vmatprep.mubr.msk.f32.mxu1 %vm2831_vm0, %v2830_v0 }
 0x105   : > { %v644_v17 = vpop.f32.mrf.mxu0 }
 0x106   : > { %2501 = vmatmul.mubr.msk.f32.gmra.mxu1 %vm682_vm2, %v644_v17 }
 0x107   : > { %v2443_v18 = vpop.f32.mrf.mxu0  ;;  %2503 = vmatprep.mubr.msk.f32.mxu1 %vm2831_vm0, %v2830_v0 }
 0x109   : > { %v649_v19 = vpop.f32.mrf.mxu0 }
 0x10a   : > { %2504 = vmatmul.mubr.msk.f32.gmra.mxu1 %vm682_vm2, %v649_v19 }
 0x10b   : > { %v2446_v20 = vpop.f32.mrf.mxu0  ;;  %2506 = vmatprep.mubr.msk.f32.mxu1 %vm2831_vm0, %v2830_v0 }
 0x10d   : > { %v654_v21 = vpop.f32.mrf.mxu0 }
 0x10e   : > { %2507 = vmatmul.mubr.msk.f32.gmra.mxu1 %vm682_vm2, %v654_v21 }
 0x10f   : > { %v2449_v22 = vpop.f32.mrf.mxu0  ;;  %2509 = vmatprep.mubr.msk.f32.mxu1 %vm2831_vm0, %v2830_v0 }
 0x111   : > { %v659_v23 = vpop.f32.mrf.mxu0 }
 0x112   : > { %2510 = vmatmul.mubr.msk.f32.gmra.mxu1 %vm682_vm2, %v659_v23 }
 0x113   : > { %v2452_v24 = vpop.f32.mrf.mxu0  ;;  %2512 = vmatprep.mubr.msk.f32.mxu1 %vm2831_vm0, %v2830_v0 }
 0x115   : > { %v664_v25 = vpop.f32.mrf.mxu0 }
 0x116   : > { %2513 = vmatmul.mubr.msk.f32.gmra.mxu1 %vm682_vm2, %v664_v25 }
 0x117   : > { %v2455_v26 = vpop.f32.mrf.mxu0  ;;  %2515 = vmatprep.mubr.msk.f32.mxu1 %vm2831_vm0, %v2830_v0 }
 0x119   : > { %v669_v27 = vpop.f32.mrf.mxu0 }
 0x11a   : > { %2516 = vmatmul.mubr.msk.f32.gmra.mxu1 %vm682_vm2, %v669_v27  ;;  %v1696_v27 = vld [vmem:[%s3686_s10] sm:$0xf] }
 0x11b   : > { %v2458_v28 = vpop.f32.mrf.mxu0  ;;  %2518 = vmatprep.mubr.msk.f32.mxu1 %vm2831_vm0, %v2830_v0  ;;  %2592 = vmatpush3.msk.msra.mxu0 %vm1748_vm3, %v1696_v27 }
 0x11c   : > { %2644 = vmatprep.subr.mxu0 %v2830_v0 }
 0x11d   : > { %v674_v30 = vpop.f32.mrf.mxu0 }
 0x11e   : > { %2519 = vmatmul.mubr.msk.f32.gmra.mxu1 %vm682_vm2, %v674_v30 }
 0x11f   : > { %v2461_v33 = vpop.f32.mrf.mxu0  ;;  %2540 = vmatprep.mubr.msk.f32.mxu1 %vm2831_vm0, %v2830_v0 }
 0x121   : > { %v3198_v34 = vpop.f32.mrf.mxu0 }
 0x123   : > { %v2531_v35 = vpop.f32.mrf.mxu0 }
 0x19e   : > { %v800_v36 = vpop.f32.mrf.mxu1 }
 0x19f   : > { %v962_v37 = vmul.f32 %v3198_v34, %v800_v36  ;;  %1919 = vrot.lane.b32.xlu1 %v800_v36, %s2832_s23 }
 0x1a0   : > { %v2472_v38 = vpop.f32.mrf.mxu1 }
 0x1a1   : > { %2541 = vmatmul.mubr.msk.f32.vlgmr.msra.gmra.mxu1 %vm682_vm2, %v962_v37  ;;  %v3297_v37 = vpop.permute.xlu0 %1429 }
 0x1a2   : > { %v805_v39 = vpop.f32.mrf.mxu1  ;;  %2543 = vmatprep.mubr.msk.f32.mxu1 %vm2831_vm0, %v2830_v0 }
 0x1a3   : > { %v963_v40 = vmul.f32 %v3198_v34, %v805_v39  ;;  %1921 = vrot.lane.b32.xlu0 %v805_v39, %s2832_s23  ;;  %v2833_v39 = vmov 1966171168  }
 0x1a4   : > { %v2475_v41 = vpop.f32.mrf.mxu1 }
 0x1a5   : > { %2544 = vmatmul.mubr.msk.f32.gmra.mxu1 %vm682_vm2, %v963_v40  ;;  %v1209_v40 = vunpack.c.l.s4 %v2833_v39  ;;  %v3301_v41 = vpop.permute.xlu1 %1436 }
 0x1a6   : > { %v810_v42 = vpop.f32.mrf.mxu1  ;;  %2546 = vmatprep.mubr.msk.f32.mxu1 %vm2831_vm0, %v2830_v0 }
 0x1a7   : > { %v964_v43 = vmul.f32 %v3198_v34, %v810_v42  ;;  %1923 = vrot.lane.b32.xlu1 %v810_v42, %s2832_s23 }
 0x1a8   : > { %v2478_v44 = vpop.f32.mrf.mxu1 }
 0x1a9   : > { %2547 = vmatmul.mubr.msk.f32.gmra.mxu1 %vm682_vm2, %v964_v43  ;;  %v1210_v44 = vunpack.c.0.s8 %v1209_v40 }
 0x1aa   : > { %v815_v45 = vpop.f32.mrf.mxu1  ;;  %2549 = vmatprep.mubr.msk.f32.mxu1 %vm2831_vm0, %v2830_v0 }
 0x1ab   : > { %v965_v46 = vmul.f32 %v3198_v34, %v815_v45  ;;  %1925 = vrot.lane.b32.xlu0 %v815_v45, %s2832_s23  ;;  %v3305_v45 = vpop.permute.xlu0 %1457 }
 0x1ac   : > { %v2481_v47 = vpop.f32.mrf.mxu1 }
 0x1ad   : > { %2550 = vmatmul.mubr.msk.f32.gmra.mxu1 %vm682_vm2, %v965_v46  ;;  %v3307_v47 = vpop.permute.xlu1 %1443 }
 0x1ae   : > { %v820_v48 = vpop.f32.mrf.mxu1  ;;  %2552 = vmatprep.mubr.msk.f32.mxu1 %vm2831_vm0, %v2830_v0 }
 0x1af   : > { %v966_v49 = vmul.f32 %v3198_v34, %v820_v48  ;;  %1927 = vrot.lane.b32.xlu1 %v820_v48, %s2832_s23 }
 0x1b0   : > { %v2484_v50 = vpop.f32.mrf.mxu1 }
 0x1b1   : > { %2553 = vmatmul.mubr.msk.f32.gmra.mxu1 %vm682_vm2, %v966_v49  ;;  %v3312_v49 = vsub.s32 %v1210_v44, %v3109_v29  ;;  %v1202_v29 = vld [vmem:[%s3684_s8 + $0x8] sm:$0xff] }
 0x1b2   : > { %v825_v51 = vpop.f32.mrf.mxu1  ;;  %2555 = vmatprep.mubr.msk.f32.mxu1 %vm2831_vm0, %v2830_v0 }
 0x1b3   : > { %v967_v52 = vmul.f32 %v3198_v34, %v825_v51  ;;  %1929 = vrot.lane.b32.xlu0 %v825_v51, %s2832_s23  ;;  %v1201_v51 = vld [vmem:[%s3684_s8] sm:$0xff] }
 0x1b4   : > { %v2487_v53 = vpop.f32.mrf.mxu1 }
 0x1b5   : > { %2556 = vmatmul.mubr.msk.f32.gmra.mxu1 %vm682_vm2, %v967_v52  ;;  %v3317_v52 = vpop.permute.xlu0 %1450  ;;  %v1207_v53 = vcombine.high %v1201_v51, %v1201_v51 }
 0x1b6   : > { %v830_v54 = vpop.f32.mrf.mxu1  ;;  %2558 = vmatprep.mubr.msk.f32.mxu1 %vm2831_vm0, %v2830_v0 }
 0x1b7   : > { %v968_v55 = vmul.f32 %v3198_v34, %v830_v54  ;;  %1931 = vrot.lane.b32.xlu1 %v830_v54, %s2832_s23 }
 0x1b8   : > { %v2490_v56 = vpop.f32.mrf.mxu1 }
 0x1b9   : > { %2559 = vmatmul.mubr.msk.f32.gmra.mxu1 %vm682_vm2, %v968_v55  ;;  %v3321_v55 = vpop.permute.xlu1 %1464  ;;  %v1214_v56 = vrot.slane %v1201_v51, %v3312_v49 }
 0x1ba   : > { %v835_v57 = vpop.f32.mrf.mxu1  ;;  %2561 = vmatprep.mubr.msk.f32.mxu1 %vm2831_vm0, %v2830_v0 }
 0x1bb   : > { %v969_v58 = vmul.f32 %v3198_v34, %v835_v57  ;;  %1933 = vrot.lane.b32.xlu0 %v835_v57, %s2832_s23 }
 0x1bc   : > { %v2493_v59 = vpop.f32.mrf.mxu1 }
 0x1bd   : > { %2562 = vmatmul.mubr.msk.f32.gmra.mxu1 %vm682_vm2, %v969_v58  ;;  %v1222_v58 = vcombine.high %v1214_v56, %v1214_v56  ;;  %v1221_v59 = vrot.slane %v1207_v53, %v3312_v49 }
 0x1be   : > { %v840_v60 = vpop.f32.mrf.mxu1  ;;  %2564 = vmatprep.mubr.msk.f32.mxu1 %vm2831_vm0, %v2830_v0 }
 0x1bf   : > { %v970_v61 = vmul.f32 %v3198_v34, %v840_v60  ;;  %1935 = vrot.lane.b32.xlu1 %v840_v60, %s2832_s23 }
 0x1c0   : > { %v2496_v62 = vpop.f32.mrf.mxu1 }
 0x1c1   : > { %2565 = vmatmul.mubr.msk.f32.gmra.mxu1 %vm682_vm2, %v970_v61  ;;  %v1256_v61 = vcombine.high %v1202_v29, %v1202_v29  ;;  %v3330_v62 = vpop.permute.xlu0 %1471 }
 0x1c2   : > { %v845_v63 = vpop.f32.mrf.mxu1  ;;  %2567 = vmatprep.mubr.msk.f32.mxu1 %vm2831_vm0, %v2830_v0 }
 0x1c3   : > { %v971_v1 = vmul.f32 %v3198_v34, %v845_v63  ;;  %1937 = vrot.lane.b32.xlu0 %v845_v63, %s2832_s23  ;;  %v1223_v63 = vcombine.high %v1221_v59, %v1221_v59 }
 0x1c4   : > { %v2499_v2 = vpop.f32.mrf.mxu1 }
 0x1c5   : > { %2568 = vmatmul.mubr.msk.f32.gmra.mxu1 %vm682_vm2, %v971_v1  ;;  %v1263_v1 = vrot.slane %v1202_v29, %v3312_v49 }
 0x1c6   : > { %v850_v3 = vpop.f32.mrf.mxu1  ;;  %2570 = vmatprep.mubr.msk.f32.mxu1 %vm2831_vm0, %v2830_v0 }
 0x1c7   : > { %v972_v4 = vmul.f32 %v3198_v34, %v850_v3  ;;  %1939 = vrot.lane.b32.xlu1 %v850_v3, %s2832_s23  ;;  %v3333_v3 = vpop.permute.xlu1 %1478 }
 0x1c8   : > { %v2502_v5 = vpop.f32.mrf.mxu1 }
 0x1c9   : > { %2571 = vmatmul.mubr.msk.f32.gmra.mxu1 %vm682_vm2, %v972_v4  ;;  %v1230_v4 = vrot.slane %v1214_v56, %v3312_v49  ;;  %v1244_v5 = vrot.slane %v1222_v58, %v3312_v49  ;;  %v2295_v58 = vld.sshfl [vmem:[%s3684_s8 + $0x10] sm:$0x1 pattern:$0x75316420] }
 0x1ca   : > { %v855_v6 = vpop.f32.mrf.mxu1  ;;  %2573 = vmatprep.mubr.msk.f32.mxu1 %vm2831_vm0, %v2830_v0 }
 0x1cb   : > { %v973_v7 = vmul.f32 %v3198_v34, %v855_v6  ;;  %1941 = vrot.lane.b32.xlu0 %v855_v6, %s2832_s23  ;;  %v1271_v6 = vcombine.high %v1263_v1, %v1263_v1 }
 0x1cc   : > { %v2505_v8 = vpop.f32.mrf.mxu1 }
 0x1cd   : > { %2574 = vmatmul.mubr.msk.f32.gmra.mxu1 %vm682_vm2, %v973_v7  ;;  %v1270_v8 = vrot.slane %v1256_v61, %v3312_v49 }
 0x1ce   : > { %v860_v9 = vpop.f32.mrf.mxu1  ;;  %2576 = vmatprep.mubr.msk.f32.mxu1 %vm2831_vm0, %v2830_v0 }
 0x1cf   : > { %v974_v10 = vmul.f32 %v3198_v34, %v860_v9  ;;  %1943 = vrot.lane.b32.xlu1 %v860_v9, %s2832_s23  ;;  %v1252_v9 = vcombine.high %v1230_v4, %v1230_v4  ;;  %v1286_v40 = vrot.slane %v1270_v8, %v3312_v49 }
 0x1d0   : > { %v2508_v11 = vpop.f32.mrf.mxu1 }
 0x1d1   : > { %2577 = vmatmul.mubr.msk.f32.gmra.mxu1 %vm682_vm2, %v974_v10  ;;  %v1254_v10 = vcombine.high %v1244_v5, %v1244_v5  ;;  %v1237_v11 = vrot.slane %v1221_v59, %v3312_v49 }
 0x1d2   : > { %v865_v12 = vpop.f32.mrf.mxu1  ;;  %2579 = vmatprep.mubr.msk.f32.mxu1 %vm2831_vm0, %v2830_v0 }
 0x1d3   : > { %v975_v13 = vmul.f32 %v3198_v34, %v865_v12  ;;  %1945 = vrot.lane.b32.xlu0 %v865_v12, %s2832_s23  ;;  %v3342_v12 = vrot.slane %v1223_v63, %v3312_v49  ;;  %v1334_v27 = vrot.slane %v1254_v10, %v3116_v32  ;;  %v1338_v39 = vrot.slane %v1237_v11, %v3116_v32 }
 0x1d4   : > { %v2511_v14 = vpop.f32.mrf.mxu1 }
 0x1d5   : > { %2580 = vmatmul.mubr.msk.f32.gmra.mxu1 %vm682_vm2, %v975_v13  ;;  %v1272_v14 = vcombine.high %v1270_v8, %v1270_v8  ;;  %v1342_v44 = vrot.slane %v3342_v12, %v3116_v32  ;;  %v1370_v8 = vrot.slane %v1286_v40, %v3116_v32 }
 0x1d6   : > { %v870_v15 = vpop.f32.mrf.mxu1  ;;  %2582 = vmatprep.mubr.msk.f32.mxu1 %vm2831_vm0, %v2830_v0 }
 0x1d7   : > { %v976_v16 = vmul.f32 %v3198_v34, %v870_v15  ;;  %1947 = vrot.lane.b32.xlu1 %v870_v15, %s2832_s23  ;;  %v3344_v15 = vpop.permute.xlu0 %1485 }
 0x1d8   : > { %v2514_v17 = vpop.f32.mrf.mxu1 }
 0x1d9   : > { %2583 = vmatmul.mubr.msk.f32.gmra.mxu1 %vm682_vm2, %v976_v16  ;;  %v1253_v16 = vcombine.high %v1237_v11, %v1237_v11  ;;  %v1255_v17 = vcombine.high %v3342_v12, %v3342_v12 }
 0x1da   : > { %v875_v18 = vpop.f32.mrf.mxu1  ;;  %2585 = vmatprep.mubr.msk.f32.mxu1 %vm2831_vm0, %v2830_v0 }
 0x1db   : > { %v977_v19 = vmul.f32 %v3198_v34, %v875_v18  ;;  %1949 = vrot.lane.b32.xlu0 %v875_v18, %s2832_s23  ;;  %v1279_v18 = vrot.slane %v1263_v1, %v3312_v49  ;;  %v3379_v59 = vpop.permute.xlu0 %1499 }
 0x1dc   : > { %v2517_v20 = vpop.f32.mrf.mxu1 }
 0x1dd   : > { %2586 = vmatmul.mubr.msk.f32.gmra.mxu1 %vm682_vm2, %v977_v19  ;;  %v3350_v19 = vrot.slane %v1271_v6, %v3312_v49  ;;  %v1354_v51 = vrot.slane %v1279_v18, %v3116_v32 }
 0x1de   : > { %v880_v21 = vpop.f32.mrf.mxu1  ;;  %2588 = vmatprep.mubr.msk.f32.mxu1 %vm2831_vm0, %v2830_v0 }
 0x1df   : > { %v978_v22 = vmul.f32 %v3198_v34, %v880_v21  ;;  %1951 = vrot.lane.b32.xlu1 %v880_v21, %s2832_s23  ;;  %v1322_v21 = vrot.slane %v1230_v4, %v3116_v32  ;;  %v1358_v56 = vrot.slane %v3350_v19, %v3116_v32  ;;  %s438_s23 = scalar_lea.vmem [#allocation2], %s2240_s15  ;;  %s2756_s15 = sshll.u32 %s2834_s20, 4  ;;  %s2757_s15 = int_to_ptr.vmem [resolvable:$false] %s2756_s15 }
 0x1e0   : > { %v2520_v23 = vpop.f32.mrf.mxu1  ;;  %s2120_s24 = sshll.u32 %s438_s23, 4  ;;  %s2758_s12 = scalar_lea.vmem %s2757_s15, 256  ;;  %s2121_s24 = int_to_ptr.vmem [resolvable:$true] %s2120_s24 }
 0x1e1   : > { %2589 = vmatmul.mubr.msk.f32.gmra.mxu1 %vm682_vm2, %v978_v22  ;;  %v1326_v22 = vrot.slane %v1244_v5, %v3116_v32  ;;  %v3354_v23 = vpop.permute.xlu1 %1492  ;;  %s2752_s0 = scalar_lea.vmem %s2121_s24, 128  ;;  %p2759_p1 = scmp.lt.s32.totalorder %s2121_s24, %s2757_s15 }
 0x1e2   : > { %p2753_p12 = scmp.ne.s32.totalorder %s2121_s24, %s2752_s0  ;;  %p2760_p2 = scmp.lt.s32.totalorder %s2758_s12, %s2752_s0 }
 0x1e4   : > { %p2754_p13 = pnand %p2753_p12, %p2935_p4  ;;  %p2761_p3 = por %p2760_p2, %p2759_p1 }
 0x1e6   : > { %p2755_p0 = pneg %p2754_p13 }
 0x1e8   : > { %p2762_p5 = pnand %p2761_p3, %p2755_p0 }
 0x261   : > { %v3283_v24 = vpop.f32.mrf.mxu1 }
 0x263   : > { %v2542_v25 = vpop.f32.mrf.mxu1 }
 0x264   : > { %v1330_v25 = vrot.slane %v1252_v9, %v3116_v32  ;;  %v1507_v9 = vpop.permute.xlu1 %1506 }
 0x265   : > { %v3285_v26 = vpop.f32.mrf.mxu1 }
 0x267   : > { %v2545_v28 = vpop.f32.mrf.mxu1 }
 0x268   : > { %v1301_v28 = vcombine.high %v1279_v18, %v1279_v18 }
 0x269   : > { %v3291_v30 = vpop.f32.mrf.mxu1 }
 0x26a   : > { %v1362_v1 = vrot.slane %v1301_v28, %v3116_v32  ;;  %v1514_v28 = vpop.permute.xlu0 %1513 }
 0x26b   : > { %v2548_v31 = vpop.f32.mrf.mxu1 }
 0x26c   : > { %v1303_v31 = vcombine.high %v3350_v19, %v3350_v19 }
 0x26d   : > { %v3293_v33 = vpop.f32.mrf.mxu1 }
 0x26e   : > { %v1187_v61 = vmul.f32 0.35355338, %v3293_v33 }
 0x26f   : > { %v2551_v34 = vpop.f32.mrf.mxu1 }
 0x271   : > { %v3295_v35 = vpop.f32.mrf.mxu1 }
 0x272   : > { %v1188_v63 = vmul.f32 0.35355338, %v3295_v35 }
 0x273   : > { %v2554_v36 = vpop.f32.mrf.mxu1 }
 0x274   : > { %v1184_v36 = vmul.f32 0.35355338, %v3283_v24  ;;  %v1185_v24 = vmul.f32 0.35355338, %v3285_v26  ;;  %v1366_v26 = vrot.slane %v1303_v31, %v3116_v32  ;;  %v1408_v18 = vadd.f32 %v1338_v39, %v1188_v63 }
 0x275   : > { %v3299_v38 = vpop.f32.mrf.mxu1 }
 0x276   : > { %v1404_v4 = vadd.f32 %v1322_v21, %v1184_v36  ;;  %v1189_v5 = vmul.f32 0.35355338, %v3299_v38  ;;  %v1318_v38 = vrot.slane %v2295_v58, %v3312_v49 }
 0x277   : > { %v2557_v42 = vpop.f32.mrf.mxu1 }
 0x278   : > { %v3364_v42 = vrot.slane %v1272_v14, %v3312_v49  ;;  %v1409_v31 = vadd.f32 %v1342_v44, %v1189_v5 }
 0x279   : > { %v3303_v43 = vpop.f32.mrf.mxu1 }
 0x27a   : > { %v1304_v29 = vcombine.high %v3364_v42, %v3364_v42  ;;  %v1190_v10 = vmul.f32 0.35355338, %v3303_v43  ;;  %v1374_v35 = vrot.slane %v3364_v42, %v3116_v32  ;;  %v1521_v42 = vpop.permute.xlu1 %1520 }
 0x27b   : > { %v2560_v46 = vpop.f32.mrf.mxu1 }
 0x27c   : > { %v1346_v46 = vrot.slane %v1253_v16, %v3116_v32  ;;  %v1382_v16 = vrot.slane %v1304_v29, %v3116_v32 }
 0x27d   : > { %v3309_v48 = vpop.f32.mrf.mxu1 }
 0x27e   : > { %v1191_v6 = vmul.f32 0.35355338, %v3309_v48  ;;  %v1186_v48 = vmul.f32 0.35355338, %v3291_v30 }
 0x27f   : > { %v2563_v50 = vpop.f32.mrf.mxu1 }
 0x280   : > { %v1350_v50 = vrot.slane %v1255_v17, %v3116_v32  ;;  %v1407_v17 = vadd.f32 %v1334_v27, %v1187_v61  ;;  %v1528_v61 = vpop.permute.xlu0 %1527 }
 0x281   : > { %v3319_v54 = vpop.f32.mrf.mxu1 }
 0x282   : > { %v1192_v11 = vmul.f32 0.35355338, %v3319_v54  ;;  %v3398_v54 = vadd.f32 %v3297_v37, %v1404_v4  ;;  %v1406_v37 = vadd.f32 %v1330_v25, %v1186_v48 }
 0x283   : > { %v2566_v57 = vpop.f32.mrf.mxu1 }
 0x284   : > { %v1302_v57 = vcombine.high %v1286_v40, %v1286_v40  ;;  %v1412_v36 = vadd.f32 %v1354_v51, %v1192_v11  ;;  %v1561_v51 = vsel %vm1560_vm4, %v3398_v54, -inf  ;;  %v1545_v63 = vadd.f32 %v3307_v47, %v1406_v37  ;;  %v1535_v47 = vpop.permute.xlu1 %1534 }
 0x285   : > { %v3328_v60 = vpop.f32.mrf.mxu1 }
 0x286   : > { %v1378_v14 = vrot.slane %v1302_v57, %v3116_v32  ;;  %v1193_v43 = vmul.f32 0.35355338, %v3328_v60  ;;  %v1386_v60 = vrot.slane %v1318_v38, %v3116_v32  ;;  %v3417_v32 = vadd.f32 %v3321_v55, %v1409_v31 }
 0x287   : > { %v2569_v2 = vpop.f32.mrf.mxu1 }
 0x288   : > { %v1413_v44 = vadd.f32 %v1358_v56, %v1193_v43 }
 0x289   : > { %v3337_v7 = vpop.f32.mrf.mxu1 }
 0x28a   : > { %v1194_v21 = vmul.f32 0.35355338, %v3337_v7  ;;  %v3409_v7 = vadd.f32 %v3305_v45, %v1408_v18 }
 0x28b   : > { %v2572_v13 = vpop.f32.mrf.mxu1 }
 0x28c   : > { %v1405_v13 = vadd.f32 %v1326_v22, %v1185_v24 }
 0x28d   : > { %v1155_v20 = vpop.f32.mrf.mxu1 }
 0x28e   : > { %v1195_v33 = vmul.f32 0.35355338, %v1155_v20  ;;  %v1411_v20 = vadd.f32 %v1350_v50, %v1191_v6  ;;  %v3402_v30 = vadd.f32 %v3301_v41, %v1405_v13  ;;  %v3406_v50 = vadd.f32 %v3317_v52, %v1407_v17 }
 0x28f   : > { %v2575_v34 = vpop.f32.mrf.mxu1  ;;  %v3423_v52 = vadd.f32 %v3344_v15, %v1412_v36  ;;  %v3435_v15 = vadd.f32 %v3354_v23, %v1413_v44  ;;  %v1567_v6 = vsel %vm1560_vm4, %v3417_v32, -inf }
 0x290   : > { %v1410_v34 = vadd.f32 %v1346_v46, %v1190_v10  ;;  %v1415_v40 = vadd.f32 %v1366_v26, %v1195_v33  ;;  %v3414_v41 = vadd.f32 %v3333_v3, %v1411_v20  ;;  %v1562_v57 = vsel %vm1560_vm4, %v3402_v30, -inf }
 0x291   : > { %v1160_v53 = vpop.f32.mrf.mxu1  ;;  %v1564_v55 = vsel %vm1560_vm4, %v3406_v50, -inf  ;;  %v1573_v23 = vsel %vm1560_vm4, %v3423_v52, -inf  ;;  %v1568_v20 = vmax.f32 %v1562_v57, %v1567_v6 }
 0x292   : > { %v1196_v22 = vmul.f32 0.35355338, %v1160_v53  ;;  %v1414_v53 = vadd.f32 %v1362_v1, %v1194_v21  ;;  %v3420_v25 = vadd.f32 %v3330_v62, %v1410_v34  ;;  %v3425_v45 = vadd.f32 %v1507_v9, %v1415_v40 }
 0x293   : > { %v2578_v2 = vpop.f32.mrf.mxu1  ;;  %v1565_v62 = vsel %vm1560_vm4, %v3409_v7, -inf  ;;  %v1571_v26 = vsel %vm1560_vm4, %v3414_v41, -inf }
 0x294   : > { %v1416_v24 = vadd.f32 %v1370_v8, %v1196_v22  ;;  %v3440_v2 = vadd.f32 %v3379_v59, %v1414_v53  ;;  %v1569_v8 = vsel %vm1560_vm4, %v3420_v25, -inf  ;;  %v1579_v9 = vsel %vm1560_vm4, %v3425_v45, -inf }
 0x295   : > { %v1165_v12 = vpop.f32.mrf.mxu1  ;;  %v1566_v13 = vmax.f32 %v1561_v51, %v1565_v62 }
 0x296   : > { %v1197_v27 = vmul.f32 0.35355338, %v1165_v12  ;;  %v3442_v4 = vadd.f32 %v1514_v28, %v1416_v24  ;;  %v1577_v48 = vsel %vm1560_vm4, %v3440_v2, -inf }
 0x297   : > { %v2581_v19 = vpop.f32.mrf.mxu1  ;;  %v1574_v22 = vmax.f32 %v1566_v13, %v1573_v23 }
 0x298   : > { %v1417_v29 = vadd.f32 %v1374_v35, %v1197_v27  ;;  %v1563_v35 = vsel %vm1560_vm4, %v1545_v63, -inf  ;;  %v1581_v17 = vsel %vm1560_vm4, %v3442_v4, -inf  ;;  %v1542_v19 = vpop.permute.xlu0 %1541 }
 0x299   : > { %v1170_v49 = vpop.f32.mrf.mxu1  ;;  %v1570_v21 = vmax.f32 %v1563_v35, %v1569_v8  ;;  %v1582_v27 = vmax.f32 %v1574_v22, %v1581_v17 }
 0x29a   : > { %v1198_v39 = vmul.f32 0.35355338, %v1170_v49  ;;  %v3452_v11 = vadd.f32 %v1521_v42, %v1417_v29 }
 0x29b   : > { %v2584_v46 = vpop.f32.mrf.mxu1  ;;  %v1578_v49 = vmax.f32 %v1570_v21, %v1577_v48 }
 0x29c   : > { %v1418_v3 = vadd.f32 %v1378_v14, %v1198_v39  ;;  %v1572_v14 = vmax.f32 %v1564_v55, %v1571_v26  ;;  %v1583_v31 = vsel %vm1560_vm4, %v3452_v11, -inf }
 0x29d   : > { %v1175_v56 = vpop.f32.mrf.mxu1 }
 0x29e   : > { %v1199_v58 = vmul.f32 0.35355338, %v1175_v56  ;;  %v3454_v59 = vadd.f32 %v1528_v61, %v1418_v3  ;;  %v1580_v28 = vmax.f32 %v1572_v14, %v1579_v9 }
 0x29f   : > { %v2587_v1 = vpop.f32.mrf.mxu1 }
 0x2a0   : > { %v1419_v5 = vadd.f32 %v1382_v16, %v1199_v58  ;;  %v1575_v16 = vsel %vm1560_vm4, %v3435_v15, -inf  ;;  %v1585_v34 = vsel %vm1560_vm4, %v3454_v59, -inf }
 0x2a1   : > { %v1180_v10 = vpop.f32.mrf.mxu1  ;;  %v1576_v40 = vmax.f32 %v1568_v20, %v1575_v16  ;;  %v1586_v37 = vmax.f32 %v1578_v49, %v1585_v34 }
 0x2a2   : > { %v3456_v33 = vadd.f32 %v1535_v47, %v1419_v5  ;;  %v1200_v12 = vmul.f32 0.35355338, %v1180_v10 }
 0x2a3   : > { %v2590_v38 = vpop.f32.mrf.mxu1  ;;  %v1584_v42 = vmax.f32 %v1576_v40, %v1583_v31 }
 0x2a4   : > { %v1587_v18 = vsel %vm1560_vm4, %v3456_v33, -inf  ;;  %v1420_v43 = vadd.f32 %v1386_v60, %v1200_v12 }
 0x2a5   : > { %v1588_v39 = vmax.f32 %v1580_v28, %v1587_v18 }
 0x2a6   : > { %v3471_v36 = vadd.f32 %v1542_v19, %v1420_v43 }
 0x2a7   : > { %v1592_v46 = vmax.f32 %v1586_v37, %v1588_v39 }
 0x2a8   : > { %v1589_v60 = vsel %vm1560_vm4, %v3471_v36, -inf }
 0x2a9   : > { %v1590_v44 = vmax.f32 %v1582_v27, %v1589_v60 }
 0x2ab   : > { %v1591_v51 = vmax.f32 %v1590_v44, %v1584_v42 }
 0x2ad   : > { %v3475_v53 = vmax.f32 %v1591_v51, %v1592_v46 }
 0x2af   : > { %v1594_v24 = vsub.f32 %v3398_v54, %v3475_v53  ;;  %v1595_v56 = vsub.f32 %v3402_v30, %v3475_v53  ;;  %v1596_v57 = vsub.f32 %v1545_v63, %v3475_v53  ;;  %v1597_v29 = vsub.f32 %v3406_v50, %v3475_v53 }
 0x2b0   : > { %v1598_v3 = vsub.f32 %v3409_v7, %v3475_v53  ;;  %v1599_v62 = vsub.f32 %v3417_v32, %v3475_v53  ;;  %v1600_v54 = vsub.f32 %v3420_v25, %v3475_v53  ;;  %v1601_v50 = vsub.f32 %v3414_v41, %v3475_v53 }
 0x2b1   : > { %v1611_v58 = vmul.f32 1.442695, %v1594_v24  ;;  %v1613_v61 = vmul.f32 1.442695, %v1595_v56  ;;  %v1615_v55 = vmul.f32 1.442695, %v1596_v57  ;;  %v1602_v7 = vsub.f32 %v3423_v52, %v3475_v53 }
 0x2b2   : > { %v1617_v1 = vmul.f32 1.442695, %v1597_v29  ;;  %v1619_v30 = vmul.f32 1.442695, %v1598_v3  ;;  %v1621_v63 = vmul.f32 1.442695, %v1599_v62  ;;  %v1603_v32 = vsub.f32 %v3435_v15, %v3475_v53 }
 0x2b3   : > { %2716 = vpow2.f32 %v1611_v58  ;;  %v1623_v26 = vmul.f32 1.442695, %v1600_v54  ;;  %v1625_v5 = vmul.f32 1.442695, %v1601_v50  ;;  %v1604_v25 = vsub.f32 %v3440_v2, %v3475_v53 }
 0x2b4   : > { %2718 = vpow2.f32 %v1613_v61  ;;  %v1627_v47 = vmul.f32 1.442695, %v1602_v7  ;;  %v1605_v41 = vsub.f32 %v3425_v45, %v3475_v53  ;;  %v1629_v6 = vmul.f32 1.442695, %v1603_v32 }
 0x2b5   : > { %2720 = vpow2.f32 %v1615_v55  ;;  %v1606_v52 = vsub.f32 %v3442_v4, %v3475_v53  ;;  %v1631_v23 = vmul.f32 1.442695, %v1604_v25  ;;  %v1607_v10 = vsub.f32 %v3452_v11, %v3475_v53 }
 0x2b6   : > { %2722 = vpow2.f32 %v1617_v1  ;;  %v1633_v45 = vmul.f32 1.442695, %v1605_v41  ;;  %v1608_v13 = vsub.f32 %v3454_v59, %v3475_v53  ;;  %v1609_v11 = vsub.f32 %v3456_v33, %v3475_v53 }
 0x2b7   : > { %2724 = vpow2.f32 %v1619_v30  ;;  %v1635_v14 = vmul.f32 1.442695, %v1606_v52  ;;  %v1637_v17 = vmul.f32 1.442695, %v1607_v10  ;;  %v1610_v59 = vsub.f32 %v3471_v36, %v3475_v53 }
 0x2b8   : > { %2726 = vpow2.f32 %v1621_v63  ;;  %v1639_v20 = vmul.f32 1.442695, %v1608_v13  ;;  %v1641_v31 = vmul.f32 1.442695, %v1609_v11 }
 0x2b9   : > { %2728 = vpow2.f32 %v1623_v26  ;;  %v1643_v49 = vmul.f32 1.442695, %v1610_v59 }
 0x2ba   : > { %2730 = vpow2.f32 %v1625_v5 }
 0x2bb   : > { %2732 = vpow2.f32 %v1627_v47 }
 0x2bc   : > { %2734 = vpow2.f32 %v1629_v6 }
 0x2bd   : > { %2736 = vpow2.f32 %v1631_v23 }
 0x2be   : > { %2738 = vpow2.f32 %v1633_v45 }
 0x2bf   : > { %2740 = vpow2.f32 %v1635_v14 }
 0x2c0   : > { %v3500_v8 = vpop.eup %2716  ;;  %2742 = vpow2.f32 %v1637_v17 }
 0x2c1   : > { %v3504_v15 = vpop.eup %2718  ;;  %v1645_v9 = vsel %vm1560_vm4, %v3500_v8, 0.0  ;;  %2744 = vpow2.f32 %v1639_v20 }
 0x2c2   : > { %v3508_v2 = vpop.eup %2720  ;;  %v1646_v12 = vsel %vm1560_vm4, %v3504_v15, 0.0  ;;  %2746 = vpow2.f32 %v1641_v31 }
 0x2c3   : > { %v3514_v35 = vpop.eup %2722  ;;  %v1647_v4 = vadd.f32 %v1646_v12, %v1645_v9  ;;  %v1648_v16 = vsel %vm1560_vm4, %v3508_v2, 0.0  ;;  %2748 = vpow2.f32 %v1643_v49 }
 0x2c4   : > { %v2725_v38 = vpop.eup %2724  ;;  %v1650_v18 = vsel %vm1560_vm4, %v3514_v35, 0.0 }
 0x2c5   : > { %v1649_v48 = vadd.f32 %v1648_v16, %v1647_v4  ;;  %v2727_v43 = vpop.eup %2726  ;;  %v1652_v21 = vsel %vm1560_vm4, %v2725_v38, 0.0 }
 0x2c6   : > { %v2729_v22 = vpop.eup %2728  ;;  %v1654_v33 = vsel %vm1560_vm4, %v2727_v43, 0.0 }
 0x2c7   : > { %v1651_v19 = vadd.f32 %v1650_v18, %v1649_v48  ;;  %v2731_v34 = vpop.eup %2730  ;;  %v1656_v27 = vsel %vm1560_vm4, %v2729_v22, 0.0 }
 0x2c8   : > { %v2733_v39 = vpop.eup %2732  ;;  %v1658_v36 = vsel %vm1560_vm4, %v2731_v34, 0.0 }
 0x2c9   : > { %v1653_v28 = vadd.f32 %v1652_v21, %v1651_v19  ;;  %v2735_v42 = vpop.eup %2734  ;;  %v1660_v44 = vsel %vm1560_vm4, %v2733_v39, 0.0  ;;  %v2020_v19 = vld [vmem:[%s3681_s5] sm:$0xff] }
 0x2ca   : > { %v2737_v46 = vpop.eup %2736  ;;  %v1662_v53 = vsel %vm1560_vm4, %v2735_v42, 0.0 }
 0x2cb   : > { %v1655_v40 = vadd.f32 %v1654_v33, %v1653_v28  ;;  %v2739_v24 = vpop.eup %2738  ;;  %v1664_v57 = vsel %vm1560_vm4, %v2737_v46, 0.0 }
 0x2cc   : > { %v2741_v29 = vpop.eup %2740  ;;  %v1666_v58 = vsel %vm1560_vm4, %v2739_v24, 0.0 }
 0x2cd   : > { %v1657_v60 = vadd.f32 %v1656_v27, %v1655_v40  ;;  %v2743_v61 = vpop.eup %2742  ;;  %v1668_v62 = vsel %vm1560_vm4, %v2741_v29, 0.0 }
 0x2ce   : > { %v2745_v1 = vpop.eup %2744  ;;  %v1670_v30 = vsel %vm1560_vm4, %v2743_v61, 0.0 }
 0x2cf   : > { %v1659_v37 = vadd.f32 %v1658_v36, %v1657_v60  ;;  %v2747_v50 = vpop.eup %2746  ;;  %v1672_v7 = vsel %vm1560_vm4, %v2745_v1, 0.0 }
 0x2d0   : > { %v2749_v26 = vpop.eup %2748  ;;  %v1674_v5 = vsel %vm1560_vm4, %v2747_v50, 0.0 }
 0x2d1   : > { %v1661_v51 = vadd.f32 %v1660_v44, %v1659_v37  ;;  %v1676_v47 = vsel %vm1560_vm4, %v2749_v26, 0.0  ;;  %v1922_v37 = vpop.permute.xlu0 %1921 }
 0x2d3   : > { %v1663_v56 = vadd.f32 %v1662_v53, %v1661_v51 }
 0x2d5   : > { %v1665_v3 = vadd.f32 %v1664_v57, %v1663_v56  ;;  %v1926_v57 = vpop.permute.xlu0 %1925 }
 0x2d7   : > { %v1667_v55 = vadd.f32 %v1666_v58, %v1665_v3 }
 0x2d9   : > { %v1669_v54 = vadd.f32 %v1668_v62, %v1667_v55 }
 0x2db   : > { %v1671_v63 = vadd.f32 %v1670_v30, %v1669_v54  ;;  %v1930_v30 = vpop.permute.xlu0 %1929 }
 0x2dd   : > { %v1673_v32 = vadd.f32 %v1672_v7, %v1671_v63 }
 0x2df   : > { %v1675_v25 = vadd.f32 %v1674_v5, %v1673_v32 }
 0x2e1   : > { %v1677_v41 = vadd.f32 %v1676_v47, %v1675_v25 }
 0x2e3   : > { %2750 = vrcp.f32 %v1677_v41 }
 0x2f0   : > { %v2751_v6 = vpop.eup %2750 }
 0x2f1   : > { %v1679_v52 = vmul.f32 %v2751_v6, %v3500_v8  ;;  %v1680_v23 = vmul.f32 %v2751_v6, %v3504_v15  ;;  %v1681_v9 = vmul.f32 %v2751_v6, %v3508_v2  ;;  %v1682_v10 = vmul.f32 %v2751_v6, %v3514_v35  ;;  %v2023_v35 = vld [vmem:[%s3681_s5 + $0x18] sm:$0xff] }
 0x2f2   : > { %v1683_v45 = vmul.f32 %v2751_v6, %v2725_v38  ;;  %v1684_v12 = vmul.f32 %v2751_v6, %v2727_v43  ;;  %v1685_v4 = vmul.f32 %v2751_v6, %v2729_v22  ;;  %v1686_v13 = vmul.f32 %v2751_v6, %v2731_v34  ;;  %v2022_v38 = vld [vmem:[%s3681_s5 + $0x10] sm:$0xff]  ;;  %v2021_v43 = vld [vmem:[%s3681_s5 + $0x8] sm:$0xff] }
 0x2f3   : > { %2594 = vmatmul.mubr.msk.f32.vlgmr.msra.gmra.mxu0 %vm1560_vm4, %v1679_v52  ;;  %v1687_v14 = vmul.f32 %v2751_v6, %v2733_v39  ;;  %v1688_v16 = vmul.f32 %v2751_v6, %v2735_v42  ;;  %v1689_v48 = vmul.f32 %v2751_v6, %v2737_v46  ;;  %v1690_v11 = vmul.f32 %v2751_v6, %v2739_v24 }
 0x2f4   : > { %2596 = vmatprep.mubr.msk.f32.mxu0 %vm2831_vm0, %v2830_v0  ;;  %v1691_v8 = vmul.f32 %v2751_v6, %v2741_v29  ;;  %v1692_v17 = vmul.f32 %v2751_v6, %v2743_v61  ;;  %v1693_v15 = vmul.f32 %v2751_v6, %v2745_v1  ;;  %v1694_v18 = vmul.f32 %v2751_v6, %v2747_v50 }
 0x2f5   : > { %v1695_v2 = vmul.f32 %v2751_v6, %v2749_v26  ;;  %2645 = vmatpush3.msra.mxu0 %v2023_v35  ;;  %v1934_v6 = vpop.permute.xlu0 %1933 }
 0x2f6   : > { %2646 = vmatprep.subr.mxu0 %v2830_v0 }
 0x2f7   : > { %2597 = vmatmul.mubr.msk.f32.gmra.mxu0 %vm1560_vm4, %v1680_v23 }
 0x2f8   : > { %2599 = vmatprep.mubr.msk.f32.mxu0 %vm2831_vm0, %v2830_v0  ;;  %2647 = vmatpush3.msra.mxu0 %v2022_v38 }
 0x2f9   : > { %2648 = vmatprep.subr.mxu0 %v2830_v0 }
 0x2fa   : > { %2649 = vmatpush3.msra.mxu0 %v2021_v43 }
 0x2fb   : > { %2600 = vmatmul.mubr.msk.f32.gmra.mxu0 %vm1560_vm4, %v1681_v9  ;;  %2650 = vmatprep.subr.mxu0 %v2830_v0 }
 0x2fc   : > { %2602 = vmatprep.mubr.msk.f32.mxu0 %vm2831_vm0, %v2830_v0  ;;  %2651 = vmatpush3.msra.mxu0 %v2020_v19 }
 0x2ff   : > { %2603 = vmatmul.mubr.msk.f32.gmra.mxu0 %vm1560_vm4, %v1682_v10 }
 0x300   : > { %2605 = vmatprep.mubr.msk.f32.mxu0 %vm2831_vm0, %v2830_v0 }
 0x303   : > { %2606 = vmatmul.mubr.msk.f32.gmra.mxu0 %vm1560_vm4, %v1683_v45 }
 0x304   : > { %2608 = vmatprep.mubr.msk.f32.mxu0 %vm2831_vm0, %v2830_v0 }
 0x307   : > { %2609 = vmatmul.mubr.msk.f32.gmra.mxu0 %vm1560_vm4, %v1684_v12 }
 0x308   : > { %2611 = vmatprep.mubr.msk.f32.mxu0 %vm2831_vm0, %v2830_v0 }
 0x30b   : > { %2612 = vmatmul.mubr.msk.f32.gmra.mxu0 %vm1560_vm4, %v1685_v4 }
 0x30c   : > { %2614 = vmatprep.mubr.msk.f32.mxu0 %vm2831_vm0, %v2830_v0 }
 0x30f   : > { %2615 = vmatmul.mubr.msk.f32.gmra.mxu0 %vm1560_vm4, %v1686_v13 }
 0x310   : > { %2617 = vmatprep.mubr.msk.f32.mxu0 %vm2831_vm0, %v2830_v0 }
 0x313   : > { %2618 = vmatmul.mubr.msk.f32.gmra.mxu0 %vm1560_vm4, %v1687_v14 }
 0x314   : > { %2620 = vmatprep.mubr.msk.f32.mxu0 %vm2831_vm0, %v2830_v0 }
 0x317   : > { %2621 = vmatmul.mubr.msk.f32.gmra.mxu0 %vm1560_vm4, %v1688_v16  ;;  %v1938_v16 = vpop.permute.xlu0 %1937 }
 0x318   : > { %2623 = vmatprep.mubr.msk.f32.mxu0 %vm2831_vm0, %v2830_v0 }
 0x31b   : > { %2624 = vmatmul.mubr.msk.f32.gmra.mxu0 %vm1560_vm4, %v1689_v48  ;;  %v1942_v43 = vpop.permute.xlu0 %1941 }
 0x31c   : > { %2626 = vmatprep.mubr.msk.f32.mxu0 %vm2831_vm0, %v2830_v0 }
 0x31f   : > { %2627 = vmatmul.mubr.msk.f32.gmra.mxu0 %vm1560_vm4, %v1690_v11 }
 0x320   : > { %2629 = vmatprep.mubr.msk.f32.mxu0 %vm2831_vm0, %v2830_v0 }
 0x323   : > { %2630 = vmatmul.mubr.msk.f32.gmra.mxu0 %vm1560_vm4, %v1691_v8 }
 0x324   : > { %2632 = vmatprep.mubr.msk.f32.mxu0 %vm2831_vm0, %v2830_v0 }
 0x327   : > { %2633 = vmatmul.mubr.msk.f32.gmra.mxu0 %vm1560_vm4, %v1692_v17 }
 0x328   : > { %2635 = vmatprep.mubr.msk.f32.mxu0 %vm2831_vm0, %v2830_v0 }
 0x32b   : > { %2636 = vmatmul.mubr.msk.f32.gmra.mxu0 %vm1560_vm4, %v1693_v15 }
 0x32c   : > { %2638 = vmatprep.mubr.msk.f32.mxu0 %vm2831_vm0, %v2830_v0 }
 0x32f   : > { %2639 = vmatmul.mubr.msk.f32.gmra.mxu0 %vm1560_vm4, %v1694_v18 }
 0x330   : > { %2641 = vmatprep.mubr.msk.f32.mxu0 %vm2831_vm0, %v2830_v0 }
 0x333   : > { %2642 = vmatmul.mubr.msk.f32.gmra.mxu0 %vm1560_vm4, %v1695_v2 }
 0x334   : > { %2652 = vmatprep.mubr.msk.f32.mxu0 %vm2831_vm0, %v2830_v0  ;;  %v1920_v0 = vpop.permute.xlu1 %1919 }
 0x338   : > { %v1924_v51 = vpop.permute.xlu1 %1923 }
 0x33c   : > { %v1928_v61 = vpop.permute.xlu1 %1927 }
 0x340   : > { %v1932_v32 = vpop.permute.xlu1 %1931 }
 0x344   : > { %v1936_v45 = vpop.permute.xlu1 %1935 }
 0x348   : > { %v1940_v15 = vpop.permute.xlu1 %1939 }
 0x3b3   : > { %v1818_v59 = vpop.f32.mrf.mxu0 }
 0x3b4   : > { %v1970_v24 = vmul.f32 %v1920_v0, %v1818_v59 }
 0x3b5   : > { %v2595_v20 = vpop.f32.mrf.mxu0 }
 0x3b6   : > { %v1987_v62 = vsel %vm682_vm2, %v1970_v24, 0.0 }
 0x3b7   : > { %v1823_v21 = vpop.f32.mrf.mxu0 }
 0x3b8   : > { %v1971_v46 = vmul.f32 %v1922_v37, %v1823_v21 }
 0x3b9   : > { %v2598_v22 = vpop.f32.mrf.mxu0 }
 0x3ba   : > { %v1988_v3 = vsel %vm682_vm2, %v1971_v46, 0.0  ;;  %v1944_v22 = vpop.permute.xlu1 %1943 }
 0x3bb   : > { %v1828_v28 = vpop.f32.mrf.mxu0  ;;  %v1989_v50 = vadd.f32 %v1988_v3, %v1987_v62 }
 0x3bc   : > { %v1972_v56 = vmul.f32 %v1924_v51, %v1828_v28 }
 0x3bd   : > { %v2601_v31 = vpop.f32.mrf.mxu0 }
 0x3be   : > { %v1990_v1 = vsel %vm682_vm2, %v1972_v56, 0.0 }
 0x3bf   : > { %v1833_v33 = vpop.f32.mrf.mxu0  ;;  %v1991_v5 = vadd.f32 %v1990_v1, %v1989_v50 }
 0x3c0   : > { %v1973_v58 = vmul.f32 %v1926_v57, %v1833_v33 }
 0x3c1   : > { %v2604_v34 = vpop.f32.mrf.mxu0 }
 0x3c2   : > { %v1992_v7 = vsel %vm682_vm2, %v1973_v58, 0.0 }
 0x3c3   : > { %v1838_v40 = vpop.f32.mrf.mxu0  ;;  %v1993_v52 = vadd.f32 %v1992_v7, %v1991_v5 }
 0x3c4   : > { %v1974_v54 = vmul.f32 %v1928_v61, %v1838_v40  ;;  %v1946_v40 = vpop.permute.xlu0 %1945 }
 0x3c5   : > { %v2607_v49 = vpop.f32.mrf.mxu0 }
 0x3c6   : > { %v1994_v47 = vsel %vm682_vm2, %v1974_v54, 0.0 }
 0x3c7   : > { %v1843_v27 = vpop.f32.mrf.mxu0  ;;  %v1995_v12 = vadd.f32 %v1994_v47, %v1993_v52 }
 0x3c8   : > { %v1975_v26 = vmul.f32 %v1930_v30, %v1843_v27  ;;  %v1950_v24 = vpop.permute.xlu0 %1949 }
 0x3c9   : > { %v2610_v39 = vpop.f32.mrf.mxu0 }
 0x3ca   : > { %v1996_v9 = vsel %vm682_vm2, %v1975_v26, 0.0 }
 0x3cb   : > { %v1848_v60 = vpop.f32.mrf.mxu0  ;;  %v1997_v48 = vadd.f32 %v1996_v9, %v1995_v12 }
 0x3cc   : > { %v1976_v41 = vmul.f32 %v1932_v32, %v1848_v60  ;;  %v2315_v32 = vld [vmem:[%s3682_s6] ss:$0 sm:$0xff] }
 0x3cd   : > { %v2613_v36 = vpop.f32.mrf.mxu0 }
 0x3ce   : > { %v1998_v13 = vsel %vm682_vm2, %v1976_v41, 0.0  ;;  %v1948_v36 = vpop.permute.xlu1 %1947 }
 0x3cf   : > { %v1853_v42 = vpop.f32.mrf.mxu0  ;;  %v1999_v18 = vadd.f32 %v1998_v13, %v1997_v48 }
 0x3d0   : > { %v1977_v10 = vmul.f32 %v1934_v6, %v1853_v42 }
 0x3d1   : > { %v2616_v44 = vpop.f32.mrf.mxu0 }
 0x3d2   : > { %v2000_v8 = vsel %vm682_vm2, %v1977_v10, 0.0  ;;  %v1952_v62 = vpop.permute.xlu1 %1951 }
 0x3d3   : > { %v1858_v53 = vpop.f32.mrf.mxu0  ;;  %v2001_v19 = vadd.f32 %v2000_v8, %v1999_v18 }
 0x3d4   : > { %v1978_v14 = vmul.f32 %v1936_v45, %v1858_v53 }
 0x3d5   : > { %v2619_v29 = vpop.f32.mrf.mxu0 }
 0x3d6   : > { %v2002_v35 = vsel %vm682_vm2, %v1978_v14, 0.0 }
 0x3d7   : > { %v1863_v55 = vpop.f32.mrf.mxu0  ;;  %v2003_v28 = vadd.f32 %v2002_v35, %v2001_v19 }
 0x3d8   : > { %v1979_v17 = vmul.f32 %v1938_v16, %v1863_v55 }
 0x3d9   : > { %v2622_v63 = vpop.f32.mrf.mxu0 }
 0x3da   : > { %v2004_v20 = vsel %vm682_vm2, %v1979_v17, 0.0 }
 0x3db   : > { %v1868_v25 = vpop.f32.mrf.mxu0  ;;  %v2005_v49 = vadd.f32 %v2004_v20, %v2003_v28 }
 0x3dc   : > { %v1980_v38 = vmul.f32 %v1940_v15, %v1868_v25 }
 0x3dd   : > { %v2625_v23 = vpop.f32.mrf.mxu0 }
 0x3de   : > { %v2006_v33 = vsel %vm682_vm2, %v1980_v38, 0.0 }
 0x3df   : > { %v1873_v4 = vpop.f32.mrf.mxu0  ;;  %v2007_v0 = vadd.f32 %v2006_v33, %v2005_v49 }
 0x3e0   : > { %v1981_v21 = vmul.f32 %v1942_v43, %v1873_v4 }
 0x3e1   : > { %v2628_v11 = vpop.f32.mrf.mxu0 }
 0x3e2   : > { %v2008_v39 = vsel %vm682_vm2, %v1981_v21, 0.0 }
 0x3e3   : > { %v1878_v2 = vpop.f32.mrf.mxu0  ;;  %v2009_v46 = vadd.f32 %v2008_v39, %v2007_v0 }
 0x3e4   : > { %v1982_v34 = vmul.f32 %v1944_v22, %v1878_v2 }
 0x3e5   : > { %v2631_v59 = vpop.f32.mrf.mxu0 }
 0x3e6   : > { %v2010_v37 = vsel %vm682_vm2, %v1982_v34, 0.0 }
 0x3e7   : > { %v1883_v31 = vpop.f32.mrf.mxu0  ;;  %v2011_v56 = vadd.f32 %v2010_v37, %v2009_v46 }
 0x3e8   : > { %v1983_v60 = vmul.f32 %v1946_v40, %v1883_v31 }
 0x3e9   : > { %v2634_v27 = vpop.f32.mrf.mxu0 }
 0x3ea   : > { %v2012_v53 = vsel %vm682_vm2, %v1983_v60, 0.0 }
 0x3eb   : > { %v1888_v42 = vpop.f32.mrf.mxu0  ;;  %v2013_v58 = vadd.f32 %v2012_v53, %v2011_v56 }
 0x3ec   : > { %v1984_v44 = vmul.f32 %v1948_v36, %v1888_v42 }
 0x3ed   : > { %v2637_v51 = vpop.f32.mrf.mxu0 }
 0x3ee   : > { %v2014_v29 = vsel %vm682_vm2, %v1984_v44, 0.0 }
 0x3ef   : > { %v1893_v57 = vpop.f32.mrf.mxu0  ;;  %v2015_v1 = vadd.f32 %v2014_v29, %v2013_v58 }
 0x3f0   : > { %v1985_v3 = vmul.f32 %v1950_v24, %v1893_v57 }
 0x3f1   : > { %v2640_v61 = vpop.f32.mrf.mxu0 }
 0x3f2   : > { %v2016_v55 = vsel %vm682_vm2, %v1985_v3, 0.0 }
 0x3f3   : > { %v1898_v54 = vpop.f32.mrf.mxu0  ;;  %v2017_v50 = vadd.f32 %v2016_v55, %v2015_v1 }
 0x3f4   : > { %v1986_v30 = vmul.f32 %v1952_v62, %v1898_v54 }
 0x3f5   : > { %v2643_v63 = vpop.f32.mrf.mxu0 }
 0x3f6   : > { %v2018_v7 = vsel %vm682_vm2, %v1986_v30, 0.0 }
 0x3f7   : > { %v2019_v26 = vadd.f32 %v2018_v7, %v2017_v50 }
 0x3f9   : > { %2653 = vmatmul.mubr.msk.f32.vlgmr.msra.gmra.mxu0 %vm682_vm2, %v2019_v26 }
 0x4b9   : > { %v2100_v5 = vpop.f32.mrf.mxu0 }
 0x4ba   : > { %v2101_v25 = vadd.f32 %v2315_v32, %v2100_v5 }
 0x4bb   : > { %v2654_v47 = vpop.f32.mrf.mxu0 }
 0x4bc   : > { %2104 = vst.msk [vmem:[%s438_s23] sm:$0xff] %vm682_vm2, %v2101_v25 }
 0x4bd   : > { %2765 = shalt.err (!%p2762_p5)
}
 0x4be   : > { %s2766_s13 = scalar_lea.hbm %s3635_s25, 128  ;;  %s2770_s23 = scalar_lea.hbm %s3687_s11, 256 }
 0x4bf   : > { %p2767_p6 = scmp.ne.s32.totalorder %s3635_s25, %s2766_s13  ;;  %p2771_p10 = scmp.lt.s32.totalorder %s3635_s25, %s3687_s11 }
 0x4c0   : > { %p2772_p11 = scmp.lt.s32.totalorder %s2770_s23, %s2766_s13 }
 0x4c1   : > { %p2768_p7 = pnand %p2767_p6, %p2935_p4 }
 0x4c2   : > { %p2773_p12 = por %p2772_p11, %p2771_p10 }
 0x4c3   : > { %p2769_p9 = pneg %p2768_p7 }
 0x4c5   : > { %p2774_p13 = pnand %p2773_p12, %p2769_p9 }
 0x4c7   : > { %2777 = shalt.err (!%p2774_p13)
}
 0x4c8   : > { %2655 = dma.vmem_to_hbm [thread:$0]  (%p2935_p4), %s2121_s24, 128, %s3635_s25, %s2106_s28  }
 0x4c9 PF: > { %p2661_p0 = scmp.ge.s32.totalorder %s2828_s22, 2  ;;  %s2132_s0 = sand.u32 1, %s2808_s17  }
 0x4ca   : > { %s2133_s20 = scalar_lea.sflag [#allocation3], %s2132_s0 }
 0x4cb   : > { %p2658_p1 = pnand %p2661_p0, %p2942_p8 }
 0x4cd   : > { %p2659_p2 = pneg %p2658_p1 }
 0x4cf   : > { %2803 = dma.done.wait (%p2659_p2), %s2133_s20, 128  }
 0x4d0   : > { %2805 = vsyncadd (%p2659_p2), %s2133_s20, 4294967168  ;;  %s24_s22 = sadd.s32 1, %s2828_s22   ;;  %s3696_s20 = sld [smem:[#allocation5_spill]] }
 0x4d1   : > { %p21_p3 = scmp.ge.s32.totalorder %s24_s22, 4   ;;  %s3697_s21 = sld [smem:[#allocation6_spill]] }
 0x4d2   : > { %s3698_s17 = smov %s2812_s18  ;;  %s3699_s18 = smov %s2816_s19 }
 0x4d3   : > { %s3700_s19 = smov %s2948_s30  ;;  %23 = sbr.rel (!%p21_p3) target bundleno = 6 (0x6), region = 108 }
 0x4d8   :  { %2138 = vsyncpa [#allocation3], 1 }
 0x4d9   :  { %2140 = vsyncpa [#allocation3 + $0x1], 1 }

</bundles_post_ra>
